<compile_context>
chip_gen: v7x
topology: tpu7x:2x2x1
jax: 0.10.0
libtpu: 0.0.40
codegen_flags: <defaults>
</compile_context>

<pallas_src>
import math

import jax
import jax.numpy as jnp
from jax.experimental import pallas as pl
from jax.experimental.pallas import tpu as pltpu  # noqa: F401  (TPU backend)


def decoder_x_kernel(z_ref, t_ref, eps_ref, inp_ref, hid_ref, pred_ref, rec_ref,
                     recon_ref, preds_ref):
    L, B, H = eps_ref.shape
    Z = z_ref.shape[1]
    W = pred_ref.shape[2] - H
    S = inp_ref.shape[1] // L              # per-step column stride (>= 3H, lane padded)
    std = jnp.float32(math.exp(0.5 * 0.005))   # exp(0.5 * log_sigma), log_sigma = 0.005

    z = z_ref[...]                         # (B, Z)
    t = t_ref[...]                         # (B, L)

    # ---- hoisted, h-independent input projection for all steps / gates ----
    # gi[:, i*S + g*H : ...] = z @ W_ig[i]^T + t[:, i] * w_ig_t[i] + bias_g[i]
    gi = (jnp.dot(z, inp_ref[0:Z, :], preferred_element_type=jnp.float32)
          + jnp.dot(t, inp_ref[Z:Z + L, :], preferred_element_type=jnp.float32)
          + inp_ref[Z + L:Z + L + 1, :])   # (B, L*S)
    eps_s = eps_ref[...] * std             # (L, B, H)

    # ---- serial GRU recurrence: one fused MXU op per step on the chain ----
    h = jnp.zeros((B, H), jnp.float32)
    for i in range(L):
        gh = (jnp.dot(h, hid_ref[i, 0:H, :], preferred_element_type=jnp.float32)
              + hid_ref[i, H:H + 1, :])    # (B, 3H); bias row = [0, 0, b_hn]
        base = i * S
        ru = jax.nn.sigmoid(gi[:, base:base + 2 * H] + gh[:, 0:2 * H])
        r = ru[:, 0:H]
        u = ru[:, H:2 * H]
        n = jnp.tanh(gi[:, base + 2 * H:base + 3 * H] + r * gh[:, 2 * H:3 * H])
        h = (1.0 - u) * n + u * h + eps_s[i]          # z_theta for step i

        # ---- Predict head for step i (independent of the recurrence;
        #      fills MXU idle slots between the serial steps) ----
        hid1 = jnp.maximum(
            jnp.dot(h, pred_ref[i, 0:H, 0:H], preferred_element_type=jnp.float32)
            + pred_ref[i, H:H + 1, 0:H], 0.0)
        out_i = jax.nn.sigmoid(
            jnp.dot(hid1, pred_ref[i, 0:H, H:H + W], preferred_element_type=jnp.float32)
            + pred_ref[i, H:H + 1, H:H + W])           # (B, W)
        preds_ref[:, i * W:(i + 1) * W] = out_i

    # ---- final reconstruction from the last z_theta ----
    recon_ref[...] = jax.nn.sigmoid(
        jnp.dot(h, rec_ref[0:H, :], preferred_element_type=jnp.float32)
        + rec_ref[H:H + 1, :])


def preprocess_params(params):
    """One-time layout plumbing (run at parameter-load time, NOT per forward).

    Packs the 11 PyTorch-layout parameter tensors into 4 lane-dense slabs:
      inp    : (Z+L+1, L*S)   rows [0:Z]   = per-step W_iz^T blocks,
                               rows [Z:Z+L] = per-step t-column weights (block diag),
                               row  [Z+L]   = combined biases (b_ih + b_hh for r/u, b_ih for n)
      hidden : (L, H+1, 3H)   [:, :H] = [W_hr|W_hz|W_hn]^T, [:, H] = [0, 0, b_hn]
      pred   : (L, H+1, H+W)  [:, :H, :H]=Wp1^T, [:, H, :H]=bp1, [:, :H, H:]=Wp2^T, [:, H, H:]=bp2
      rec    : (H+1, X)       [:H] = Wr^T, [H] = br
    """
    (w_ihz, w_iht, b_ih, w_hh, b_hh, wp1, bp1, wp2, bp2, wr, br) = params
    L, threeH, Z = w_ihz.shape
    H = threeH // 3
    S = -(-threeH // 128) * 128           # per-step stride padded to 128 lanes

    inp = jnp.zeros((Z + L + 1, L * S), jnp.float32)
    for i in range(L):
        inp = inp.at[0:Z, i * S:i * S + threeH].set(jnp.transpose(w_ihz[i]))
        inp = inp.at[Z + i, i * S:i * S + threeH].set(w_iht[i, 0])
        bias_i = jnp.concatenate(
            [b_ih[i, 0, :2 * H] + b_hh[i, 0, :2 * H], b_ih[i, 0, 2 * H:]], axis=0)
        inp = inp.at[Z + L, i * S:i * S + threeH].set(bias_i)

    hid_bias = jnp.concatenate(
        [jnp.zeros((L, 1, 2 * H), jnp.float32), b_hh[:, :, 2 * H:]], axis=2)
    hidden = jnp.concatenate([jnp.swapaxes(w_hh, 1, 2), hid_bias], axis=1)

    pred_top = jnp.concatenate(
        [jnp.swapaxes(wp1, 1, 2), jnp.swapaxes(wp2, 1, 2)], axis=2)
    pred_bot = jnp.concatenate([bp1, bp2], axis=2)
    pred = jnp.concatenate([pred_top, pred_bot], axis=1)

    rec = jnp.concatenate([jnp.transpose(wr), br], axis=0)
    return (inp, hidden, pred, rec)


@jax.jit
def decoder_x_forward(z, t, eps, packed):
    """Steady-state forward: single pallas_call + tiny output permutation."""
    inp, hidden, pred, rec = packed
    B = z.shape[0]
    L = t.shape[1]
    H = eps.shape[2]
    W = pred.shape[2] - H
    X = rec.shape[1]

    recon, preds = pl.pallas_call(
        decoder_x_kernel,
        out_shape=(
            jax.ShapeDtypeStruct((B, X), jnp.float32),
            jax.ShapeDtypeStruct((B, L * W), jnp.float32),
        ),
        # No grid: single invocation, all slabs resident in VMEM
        # (default whole-array BlockSpecs); total footprint << VMEM.
    )(z, t, eps, inp, hidden, pred, rec)

    # Match PyTorch output layout: workers_preds[w, b, i] = predict_i(z_theta_i)[b, w].
    workers_preds = jnp.transpose(preds.reshape(B, L, W), (2, 0, 1))
    return recon, workers_preds


def reference_forward(z, t, eps, params):
    """Pure-JAX reference of Decoder_x.forward with the same eps."""
    (w_ihz, w_iht, b_ih, w_hh, b_hh, wp1, bp1, wp2, bp2, wr, br) = params
    B = z.shape[0]
    L = t.shape[1]
    H = w_hh.shape[2]
    h = jnp.zeros((B, H), jnp.float32)
    std = jnp.exp(jnp.float32(0.5 * 0.005))
    preds = []
    for i in range(L):
        t_col = t[:, i:i + 1]
        gi = z @ w_ihz[i].T + t_col * w_iht[i] + b_ih[i]
        gh = h @ w_hh[i].T + b_hh[i]
        r = jax.nn.sigmoid(gi[:, :H] + gh[:, :H])
        u = jax.nn.sigmoid(gi[:, H:2 * H] + gh[:, H:2 * H])
        n = jnp.tanh(gi[:, 2 * H:] + r * gh[:, 2 * H:])
        mu = (1.0 - u) * n + u * h
        h = mu + std * eps[i]
        hid = jnp.maximum(h @ wp1[i].T + bp1[i], 0.0)
        preds.append(jax.nn.sigmoid(hid @ wp2[i].T + bp2[i]))
    recon = jax.nn.sigmoid(h @ wr.T + br)
    workers_preds = jnp.transpose(jnp.stack(preds, 0), (2, 1, 0))
    return recon, workers_preds


if __name__ == "__main__":
    # Small, forward-consistent sizes: args.z_dim=4, args.h_dim=32,
    # args.y_dim(len)=8, args.x_dim=16, args.workers=4, batch=8.
    B, Z, H, L, X, W = 8, 4, 32, 8, 16, 4

    key = jax.random.PRNGKey(0)
    ks = jax.random.split(key, 14)

    def unif(k, shape, bound):
        return jax.random.uniform(k, shape, jnp.float32, -bound, bound)

    kg = 1.0 / jnp.sqrt(H)      # GRUCell init bound
    kl1 = 1.0 / jnp.sqrt(H)     # Linear(h, h) / Linear(h, workers) / reconstruct

    w_ih_full = unif(ks[0], (L, 3 * H, Z + 1), kg)
    w_ihz = w_ih_full[:, :, :Z]                       # (L, 3H, Z)
    w_iht = w_ih_full[:, :, Z].reshape(L, 1, 3 * H)   # (L, 1, 3H)
    b_ih = unif(ks[1], (L, 1, 3 * H), kg)
    w_hh = unif(ks[2], (L, 3 * H, H), kg)
    b_hh = unif(ks[3], (L, 1, 3 * H), kg)
    wp1 = unif(ks[4], (L, H, H), kl1)
    bp1 = unif(ks[5], (L, 1, H), kl1)
    wp2 = unif(ks[6], (L, W, H), kl1)
    bp2 = unif(ks[7], (L, 1, W), kl1)
    wr = unif(ks[8], (X, H), kl1)
    br = unif(ks[9], (1, X), kl1)
    params = (w_ihz, w_iht, b_ih, w_hh, b_hh, wp1, bp1, wp2, bp2, wr, br)

    z = jax.random.normal(ks[10], (B, Z), jnp.float32)
    t = jax.random.normal(ks[11], (B, L), jnp.float32)
    eps = jax.random.uniform(ks[12], (L, B, H), jnp.float32)  # torch.rand analogue

    packed = preprocess_params(params)          # one-time layout plumbing
    packed = jax.tree_util.tree_map(jax.block_until_ready, packed)

    recon, workers_preds = decoder_x_forward(z, t, eps, packed)
    recon = jax.block_until_ready(recon)
    workers_preds = jax.block_until_ready(workers_preds)

    assert recon.shape == (B, X)
    assert workers_preds.shape == (W, B, L)

    recon_ref, preds_ref = reference_forward(z, t, eps, params)
    assert jnp.allclose(recon, recon_ref, atol=1e-3, rtol=1e-3)
    assert jnp.allclose(workers_preds, preds_ref, atol=1e-3, rtol=1e-3)

    print("KERNEL_OK")
</pallas_src>

<mosaic_0001>
module attributes {stable_mosaic.version = 11 : i64} {
  func.func @decoder_x_kernel(%arg0: memref<8x4xf32, #tpu.memory_space<vmem>>, %arg1: memref<8x8xf32, #tpu.memory_space<vmem>>, %arg2: memref<8x8x32xf32, #tpu.memory_space<vmem>>, %arg3: memref<13x1024xf32, #tpu.memory_space<vmem>>, %arg4: memref<8x33x96xf32, #tpu.memory_space<vmem>>, %arg5: memref<8x33x36xf32, #tpu.memory_space<vmem>>, %arg6: memref<33x16xf32, #tpu.memory_space<vmem>>, %arg7: memref<8x16xf32, #tpu.memory_space<vmem>>, %arg8: memref<8x32xf32, #tpu.memory_space<vmem>>) attributes {dimension_semantics = [], scalar_prefetch = 0 : i64, scratch_operands = 0 : i64, tpu.core_type = #tpu.core_type<tc>} {
    %c0 = arith.constant 0 : index
    %c0_0 = arith.constant 0 : index
    %0 = vector.load %arg0[%c0, %c0_0] : memref<8x4xf32, #tpu.memory_space<vmem>>, vector<8x4xf32>
    %c0_1 = arith.constant 0 : index
    %c0_2 = arith.constant 0 : index
    %1 = vector.load %arg1[%c0_1, %c0_2] : memref<8x8xf32, #tpu.memory_space<vmem>>, vector<8x8xf32>
    %c0_3 = arith.constant 0 : index
    %c0_4 = arith.constant 0 : index
    %2 = vector.load %arg3[%c0_3, %c0_4] : memref<13x1024xf32, #tpu.memory_space<vmem>>, vector<4x1024xf32>
    %cst = arith.constant dense<0.000000e+00> : vector<8x1024xf32>
    %3 = tpu.matmul %0, %2, %cst {dimension_numbers = #tpu.dot_dimension_numbers<[1], [0], [0], [1], [0, 0, 1, 1], [], []>} : vector<8x4xf32>, vector<4x1024xf32>, vector<8x1024xf32> -> vector<8x1024xf32>
    %c4 = arith.constant 4 : index
    %c0_5 = arith.constant 0 : index
    %4 = vector.load %arg3[%c4, %c0_5] : memref<13x1024xf32, #tpu.memory_space<vmem>>, vector<8x1024xf32>
    %cst_6 = arith.constant dense<0.000000e+00> : vector<8x1024xf32>
    %5 = tpu.matmul %1, %4, %cst_6 {dimension_numbers = #tpu.dot_dimension_numbers<[1], [0], [0], [1], [0, 0, 1, 1], [], []>} : vector<8x8xf32>, vector<8x1024xf32>, vector<8x1024xf32> -> vector<8x1024xf32>
    %6 = arith.addf %3, %5 : vector<8x1024xf32>
    %c12 = arith.constant 12 : index
    %c0_7 = arith.constant 0 : index
    %7 = vector.load %arg3[%c12, %c0_7] : memref<13x1024xf32, #tpu.memory_space<vmem>>, vector<1x1024xf32>
    %8 = vector.broadcast %7 : vector<1x1024xf32> to vector<8x1024xf32>
    %9 = arith.addf %6, %8 : vector<8x1024xf32>
    %c0_8 = arith.constant 0 : index
    %c0_9 = arith.constant 0 : index
    %c0_10 = arith.constant 0 : index
    %10 = vector.load %arg2[%c0_8, %c0_9, %c0_10] : memref<8x8x32xf32, #tpu.memory_space<vmem>>, vector<8x8x32xf32>
    %cst_11 = arith.constant 1.00250316 : f32
    %11 = vector.broadcast %cst_11 : f32 to vector<8x8x32xf32>
    %12 = arith.mulf %10, %11 : vector<8x8x32xf32>
    %cst_12 = arith.constant 0.000000e+00 : f32
    %13 = vector.broadcast %cst_12 : f32 to vector<8x32xf32>
    %c0_13 = arith.constant 0 : index
    %c0_14 = arith.constant 0 : index
    %c0_15 = arith.constant 0 : index
    %14 = vector.load %arg4[%c0_13, %c0_14, %c0_15] : memref<8x33x96xf32, #tpu.memory_space<vmem>>, vector<1x32x96xf32>
    %15 = vector.shape_cast %14 : vector<1x32x96xf32> to vector<32x96xf32>
    %cst_16 = arith.constant dense<0.000000e+00> : vector<8x96xf32>
    %16 = tpu.matmul %13, %15, %cst_16 {dimension_numbers = #tpu.dot_dimension_numbers<[1], [0], [0], [1], [0, 0, 1, 1], [], []>} : vector<8x32xf32>, vector<32x96xf32>, vector<8x96xf32> -> vector<8x96xf32>
    %c0_17 = arith.constant 0 : index
    %c32 = arith.constant 32 : index
    %c0_18 = arith.constant 0 : index
    %17 = vector.load %arg4[%c0_17, %c32, %c0_18] : memref<8x33x96xf32, #tpu.memory_space<vmem>>, vector<1x1x96xf32>
    %18 = vector.shape_cast %17 : vector<1x1x96xf32> to vector<1x96xf32>
    %19 = vector.broadcast %18 : vector<1x96xf32> to vector<8x96xf32>
    %20 = arith.addf %16, %19 : vector<8x96xf32>
    %21 = vector.extract_strided_slice %9 {offsets = [0, 0], sizes = [8, 64], strides = [1, 1]} : vector<8x1024xf32> to vector<8x64xf32>
    %22 = vector.extract_strided_slice %20 {offsets = [0, 0], sizes = [8, 64], strides = [1, 1]} : vector<8x96xf32> to vector<8x64xf32>
    %23 = arith.addf %21, %22 : vector<8x64xf32>
    %24 = arith.negf %23 : vector<8x64xf32>
    %25 = math.exp %24 : vector<8x64xf32>
    %cst_19 = arith.constant 1.000000e+00 : f32
    %26 = vector.broadcast %cst_19 : f32 to vector<8x64xf32>
    %27 = arith.addf %26, %25 : vector<8x64xf32>
    %28 = arith.divf %26, %27 : vector<8x64xf32>
    %29 = vector.extract_strided_slice %28 {offsets = [0, 0], sizes = [8, 32], strides = [1, 1]} : vector<8x64xf32> to vector<8x32xf32>
    %30 = vector.extract_strided_slice %28 {offsets = [0, 32], sizes = [8, 32], strides = [1, 1]} : vector<8x64xf32> to vector<8x32xf32>
    %31 = vector.extract_strided_slice %9 {offsets = [0, 64], sizes = [8, 32], strides = [1, 1]} : vector<8x1024xf32> to vector<8x32xf32>
    %32 = vector.extract_strided_slice %20 {offsets = [0, 64], sizes = [8, 32], strides = [1, 1]} : vector<8x96xf32> to vector<8x32xf32>
    %33 = arith.mulf %29, %32 : vector<8x32xf32>
    %34 = arith.addf %31, %33 : vector<8x32xf32>
    %35 = math.tanh %34 : vector<8x32xf32>
    %cst_20 = arith.constant 1.000000e+00 : f32
    %36 = vector.broadcast %cst_20 : f32 to vector<8x32xf32>
    %37 = arith.subf %36, %30 : vector<8x32xf32>
    %38 = arith.mulf %37, %35 : vector<8x32xf32>
    %39 = arith.mulf %30, %13 : vector<8x32xf32>
    %40 = arith.addf %38, %39 : vector<8x32xf32>
    %41 = vector.extract_strided_slice %12 {offsets = [0, 0, 0], sizes = [1, 8, 32], strides = [1, 1, 1]} : vector<8x8x32xf32> to vector<1x8x32xf32>
    %42 = vector.shape_cast %41 : vector<1x8x32xf32> to vector<8x32xf32>
    %43 = arith.addf %40, %42 : vector<8x32xf32>
    %c0_21 = arith.constant 0 : index
    %c0_22 = arith.constant 0 : index
    %c0_23 = arith.constant 0 : index
    %44 = vector.load %arg5[%c0_21, %c0_22, %c0_23] : memref<8x33x36xf32, #tpu.memory_space<vmem>>, vector<1x32x32xf32>
    %45 = vector.shape_cast %44 : vector<1x32x32xf32> to vector<32x32xf32>
    %cst_24 = arith.constant dense<0.000000e+00> : vector<8x32xf32>
    %46 = tpu.matmul %43, %45, %cst_24 {dimension_numbers = #tpu.dot_dimension_numbers<[1], [0], [0], [1], [0, 0, 1, 1], [], []>} : vector<8x32xf32>, vector<32x32xf32>, vector<8x32xf32> -> vector<8x32xf32>
    %c0_25 = arith.constant 0 : index
    %c32_26 = arith.constant 32 : index
    %c0_27 = arith.constant 0 : index
    %47 = vector.load %arg5[%c0_25, %c32_26, %c0_27] : memref<8x33x36xf32, #tpu.memory_space<vmem>>, vector<1x1x32xf32>
    %48 = vector.shape_cast %47 : vector<1x1x32xf32> to vector<1x32xf32>
    %49 = vector.broadcast %48 : vector<1x32xf32> to vector<8x32xf32>
    %50 = arith.addf %46, %49 : vector<8x32xf32>
    %cst_28 = arith.constant 0.000000e+00 : f32
    %51 = vector.broadcast %cst_28 : f32 to vector<8x32xf32>
    %52 = arith.maximumf %50, %51 : vector<8x32xf32>
    %c0_29 = arith.constant 0 : index
    %c0_30 = arith.constant 0 : index
    %c32_31 = arith.constant 32 : index
    %53 = vector.load %arg5[%c0_29, %c0_30, %c32_31] : memref<8x33x36xf32, #tpu.memory_space<vmem>>, vector<1x32x4xf32>
    %54 = vector.shape_cast %53 : vector<1x32x4xf32> to vector<32x4xf32>
    %cst_32 = arith.constant dense<0.000000e+00> : vector<8x4xf32>
    %55 = tpu.matmul %52, %54, %cst_32 {dimension_numbers = #tpu.dot_dimension_numbers<[1], [0], [0], [1], [0, 0, 1, 1], [], []>} : vector<8x32xf32>, vector<32x4xf32>, vector<8x4xf32> -> vector<8x4xf32>
    %c0_33 = arith.constant 0 : index
    %c32_34 = arith.constant 32 : index
    %c32_35 = arith.constant 32 : index
    %56 = vector.load %arg5[%c0_33, %c32_34, %c32_35] : memref<8x33x36xf32, #tpu.memory_space<vmem>>, vector<1x1x4xf32>
    %57 = vector.shape_cast %56 : vector<1x1x4xf32> to vector<1x4xf32>
    %58 = vector.broadcast %57 : vector<1x4xf32> to vector<8x4xf32>
    %59 = arith.addf %55, %58 : vector<8x4xf32>
    %60 = arith.negf %59 : vector<8x4xf32>
    %61 = math.exp %60 : vector<8x4xf32>
    %cst_36 = arith.constant 1.000000e+00 : f32
    %62 = vector.broadcast %cst_36 : f32 to vector<8x4xf32>
    %63 = arith.addf %62, %61 : vector<8x4xf32>
    %64 = arith.divf %62, %63 : vector<8x4xf32>
    %c0_37 = arith.constant 0 : index
    %c0_38 = arith.constant 0 : index
    %65 = vector.load %arg8[%c0_37, %c0_38] : memref<8x32xf32, #tpu.memory_space<vmem>>, vector<8x4xf32>
    tpu.vector_store %arg8[%c0_37, %c0_38], %64 {strides = array<i32>} : memref<8x32xf32, #tpu.memory_space<vmem>>, vector<8x4xf32>,
    %c1 = arith.constant 1 : index
    %c0_39 = arith.constant 0 : index
    %c0_40 = arith.constant 0 : index
    %66 = vector.load %arg4[%c1, %c0_39, %c0_40] : memref<8x33x96xf32, #tpu.memory_space<vmem>>, vector<1x32x96xf32>
    %67 = vector.shape_cast %66 : vector<1x32x96xf32> to vector<32x96xf32>
    %cst_41 = arith.constant dense<0.000000e+00> : vector<8x96xf32>
    %68 = tpu.matmul %43, %67, %cst_41 {dimension_numbers = #tpu.dot_dimension_numbers<[1], [0], [0], [1], [0, 0, 1, 1], [], []>} : vector<8x32xf32>, vector<32x96xf32>, vector<8x96xf32> -> vector<8x96xf32>
    %c1_42 = arith.constant 1 : index
    %c32_43 = arith.constant 32 : index
    %c0_44 = arith.constant 0 : index
    %69 = vector.load %arg4[%c1_42, %c32_43, %c0_44] : memref<8x33x96xf32, #tpu.memory_space<vmem>>, vector<1x1x96xf32>
    %70 = vector.shape_cast %69 : vector<1x1x96xf32> to vector<1x96xf32>
    %71 = vector.broadcast %70 : vector<1x96xf32> to vector<8x96xf32>
    %72 = arith.addf %68, %71 : vector<8x96xf32>
    %73 = vector.extract_strided_slice %9 {offsets = [0, 128], sizes = [8, 64], strides = [1, 1]} : vector<8x1024xf32> to vector<8x64xf32>
    %74 = vector.extract_strided_slice %72 {offsets = [0, 0], sizes = [8, 64], strides = [1, 1]} : vector<8x96xf32> to vector<8x64xf32>
    %75 = arith.addf %73, %74 : vector<8x64xf32>
    %76 = arith.negf %75 : vector<8x64xf32>
    %77 = math.exp %76 : vector<8x64xf32>
    %cst_45 = arith.constant 1.000000e+00 : f32
    %78 = vector.broadcast %cst_45 : f32 to vector<8x64xf32>
    %79 = arith.addf %78, %77 : vector<8x64xf32>
    %80 = arith.divf %78, %79 : vector<8x64xf32>
    %81 = vector.extract_strided_slice %80 {offsets = [0, 0], sizes = [8, 32], strides = [1, 1]} : vector<8x64xf32> to vector<8x32xf32>
    %82 = vector.extract_strided_slice %80 {offsets = [0, 32], sizes = [8, 32], strides = [1, 1]} : vector<8x64xf32> to vector<8x32xf32>
    %83 = vector.extract_strided_slice %9 {offsets = [0, 192], sizes = [8, 32], strides = [1, 1]} : vector<8x1024xf32> to vector<8x32xf32>
    %84 = vector.extract_strided_slice %72 {offsets = [0, 64], sizes = [8, 32], strides = [1, 1]} : vector<8x96xf32> to vector<8x32xf32>
    %85 = arith.mulf %81, %84 : vector<8x32xf32>
    %86 = arith.addf %83, %85 : vector<8x32xf32>
    %87 = math.tanh %86 : vector<8x32xf32>
    %cst_46 = arith.constant 1.000000e+00 : f32
    %88 = vector.broadcast %cst_46 : f32 to vector<8x32xf32>
    %89 = arith.subf %88, %82 : vector<8x32xf32>
    %90 = arith.mulf %89, %87 : vector<8x32xf32>
    %91 = arith.mulf %82, %43 : vector<8x32xf32>
    %92 = arith.addf %90, %91 : vector<8x32xf32>
    %93 = vector.extract_strided_slice %12 {offsets = [1, 0, 0], sizes = [1, 8, 32], strides = [1, 1, 1]} : vector<8x8x32xf32> to vector<1x8x32xf32>
    %94 = vector.shape_cast %93 : vector<1x8x32xf32> to vector<8x32xf32>
    %95 = arith.addf %92, %94 : vector<8x32xf32>
    %c1_47 = arith.constant 1 : index
    %c0_48 = arith.constant 0 : index
    %c0_49 = arith.constant 0 : index
    %96 = vector.load %arg5[%c1_47, %c0_48, %c0_49] : memref<8x33x36xf32, #tpu.memory_space<vmem>>, vector<1x32x32xf32>
    %97 = vector.shape_cast %96 : vector<1x32x32xf32> to vector<32x32xf32>
    %cst_50 = arith.constant dense<0.000000e+00> : vector<8x32xf32>
    %98 = tpu.matmul %95, %97, %cst_50 {dimension_numbers = #tpu.dot_dimension_numbers<[1], [0], [0], [1], [0, 0, 1, 1], [], []>} : vector<8x32xf32>, vector<32x32xf32>, vector<8x32xf32> -> vector<8x32xf32>
    %c1_51 = arith.constant 1 : index
    %c32_52 = arith.constant 32 : index
    %c0_53 = arith.constant 0 : index
    %99 = vector.load %arg5[%c1_51, %c32_52, %c0_53] : memref<8x33x36xf32, #tpu.memory_space<vmem>>, vector<1x1x32xf32>
    %100 = vector.shape_cast %99 : vector<1x1x32xf32> to vector<1x32xf32>
    %101 = vector.broadcast %100 : vector<1x32xf32> to vector<8x32xf32>
    %102 = arith.addf %98, %101 : vector<8x32xf32>
    %cst_54 = arith.constant 0.000000e+00 : f32
    %103 = vector.broadcast %cst_54 : f32 to vector<8x32xf32>
    %104 = arith.maximumf %102, %103 : vector<8x32xf32>
    %c1_55 = arith.constant 1 : index
    %c0_56 = arith.constant 0 : index
    %c32_57 = arith.constant 32 : index
    %105 = vector.load %arg5[%c1_55, %c0_56, %c32_57] : memref<8x33x36xf32, #tpu.memory_space<vmem>>, vector<1x32x4xf32>
    %106 = vector.shape_cast %105 : vector<1x32x4xf32> to vector<32x4xf32>
    %cst_58 = arith.constant dense<0.000000e+00> : vector<8x4xf32>
    %107 = tpu.matmul %104, %106, %cst_58 {dimension_numbers = #tpu.dot_dimension_numbers<[1], [0], [0], [1], [0, 0, 1, 1], [], []>} : vector<8x32xf32>, vector<32x4xf32>, vector<8x4xf32> -> vector<8x4xf32>
    %c1_59 = arith.constant 1 : index
    %c32_60 = arith.constant 32 : index
    %c32_61 = arith.constant 32 : index
    %108 = vector.load %arg5[%c1_59, %c32_60, %c32_61] : memref<8x33x36xf32, #tpu.memory_space<vmem>>, vector<1x1x4xf32>
    %109 = vector.shape_cast %108 : vector<1x1x4xf32> to vector<1x4xf32>
    %110 = vector.broadcast %109 : vector<1x4xf32> to vector<8x4xf32>
    %111 = arith.addf %107, %110 : vector<8x4xf32>
    %112 = arith.negf %111 : vector<8x4xf32>
    %113 = math.exp %112 : vector<8x4xf32>
    %cst_62 = arith.constant 1.000000e+00 : f32
    %114 = vector.broadcast %cst_62 : f32 to vector<8x4xf32>
    %115 = arith.addf %114, %113 : vector<8x4xf32>
    %116 = arith.divf %114, %115 : vector<8x4xf32>
    %c0_63 = arith.constant 0 : index
    %c4_64 = arith.constant 4 : index
    %117 = vector.load %arg8[%c0_63, %c4_64] : memref<8x32xf32, #tpu.memory_space<vmem>>, vector<8x4xf32>
    tpu.vector_store %arg8[%c0_63, %c4_64], %116 {strides = array<i32>} : memref<8x32xf32, #tpu.memory_space<vmem>>, vector<8x4xf32>,
    %c2 = arith.constant 2 : index
    %c0_65 = arith.constant 0 : index
    %c0_66 = arith.constant 0 : index
    %118 = vector.load %arg4[%c2, %c0_65, %c0_66] : memref<8x33x96xf32, #tpu.memory_space<vmem>>, vector<1x32x96xf32>
    %119 = vector.shape_cast %118 : vector<1x32x96xf32> to vector<32x96xf32>
    %cst_67 = arith.constant dense<0.000000e+00> : vector<8x96xf32>
    %120 = tpu.matmul %95, %119, %cst_67 {dimension_numbers = #tpu.dot_dimension_numbers<[1], [0], [0], [1], [0, 0, 1, 1], [], []>} : vector<8x32xf32>, vector<32x96xf32>, vector<8x96xf32> -> vector<8x96xf32>
    %c2_68 = arith.constant 2 : index
    %c32_69 = arith.constant 32 : index
    %c0_70 = arith.constant 0 : index
    %121 = vector.load %arg4[%c2_68, %c32_69, %c0_70] : memref<8x33x96xf32, #tpu.memory_space<vmem>>, vector<1x1x96xf32>
    %122 = vector.shape_cast %121 : vector<1x1x96xf32> to vector<1x96xf32>
    %123 = vector.broadcast %122 : vector<1x96xf32> to vector<8x96xf32>
    %124 = arith.addf %120, %123 : vector<8x96xf32>
    %125 = vector.extract_strided_slice %9 {offsets = [0, 256], sizes = [8, 64], strides = [1, 1]} : vector<8x1024xf32> to vector<8x64xf32>
    %126 = vector.extract_strided_slice %124 {offsets = [0, 0], sizes = [8, 64], strides = [1, 1]} : vector<8x96xf32> to vector<8x64xf32>
    %127 = arith.addf %125, %126 : vector<8x64xf32>
    %128 = arith.negf %127 : vector<8x64xf32>
    %129 = math.exp %128 : vector<8x64xf32>
    %cst_71 = arith.constant 1.000000e+00 : f32
    %130 = vector.broadcast %cst_71 : f32 to vector<8x64xf32>
    %131 = arith.addf %130, %129 : vector<8x64xf32>
    %132 = arith.divf %130, %131 : vector<8x64xf32>
    %133 = vector.extract_strided_slice %132 {offsets = [0, 0], sizes = [8, 32], strides = [1, 1]} : vector<8x64xf32> to vector<8x32xf32>
    %134 = vector.extract_strided_slice %132 {offsets = [0, 32], sizes = [8, 32], strides = [1, 1]} : vector<8x64xf32> to vector<8x32xf32>
    %135 = vector.extract_strided_slice %9 {offsets = [0, 320], sizes = [8, 32], strides = [1, 1]} : vector<8x1024xf32> to vector<8x32xf32>
    %136 = vector.extract_strided_slice %124 {offsets = [0, 64], sizes = [8, 32], strides = [1, 1]} : vector<8x96xf32> to vector<8x32xf32>
    %137 = arith.mulf %133, %136 : vector<8x32xf32>
    %138 = arith.addf %135, %137 : vector<8x32xf32>
    %139 = math.tanh %138 : vector<8x32xf32>
    %cst_72 = arith.constant 1.000000e+00 : f32
    %140 = vector.broadcast %cst_72 : f32 to vector<8x32xf32>
    %141 = arith.subf %140, %134 : vector<8x32xf32>
    %142 = arith.mulf %141, %139 : vector<8x32xf32>
    %143 = arith.mulf %134, %95 : vector<8x32xf32>
    %144 = arith.addf %142, %143 : vector<8x32xf32>
    %145 = vector.extract_strided_slice %12 {offsets = [2, 0, 0], sizes = [1, 8, 32], strides = [1, 1, 1]} : vector<8x8x32xf32> to vector<1x8x32xf32>
    %146 = vector.shape_cast %145 : vector<1x8x32xf32> to vector<8x32xf32>
    %147 = arith.addf %144, %146 : vector<8x32xf32>
    %c2_73 = arith.constant 2 : index
    %c0_74 = arith.constant 0 : index
    %c0_75 = arith.constant 0 : index
    %148 = vector.load %arg5[%c2_73, %c0_74, %c0_75] : memref<8x33x36xf32, #tpu.memory_space<vmem>>, vector<1x32x32xf32>
    %149 = vector.shape_cast %148 : vector<1x32x32xf32> to vector<32x32xf32>
    %cst_76 = arith.constant dense<0.000000e+00> : vector<8x32xf32>
    %150 = tpu.matmul %147, %149, %cst_76 {dimension_numbers = #tpu.dot_dimension_numbers<[1], [0], [0], [1], [0, 0, 1, 1], [], []>} : vector<8x32xf32>, vector<32x32xf32>, vector<8x32xf32> -> vector<8x32xf32>
    %c2_77 = arith.constant 2 : index
    %c32_78 = arith.constant 32 : index
    %c0_79 = arith.constant 0 : index
    %151 = vector.load %arg5[%c2_77, %c32_78, %c0_79] : memref<8x33x36xf32, #tpu.memory_space<vmem>>, vector<1x1x32xf32>
    %152 = vector.shape_cast %151 : vector<1x1x32xf32> to vector<1x32xf32>
    %153 = vector.broadcast %152 : vector<1x32xf32> to vector<8x32xf32>
    %154 = arith.addf %150, %153 : vector<8x32xf32>
    %cst_80 = arith.constant 0.000000e+00 : f32
    %155 = vector.broadcast %cst_80 : f32 to vector<8x32xf32>
    %156 = arith.maximumf %154, %155 : vector<8x32xf32>
    %c2_81 = arith.constant 2 : index
    %c0_82 = arith.constant 0 : index
    %c32_83 = arith.constant 32 : index
    %157 = vector.load %arg5[%c2_81, %c0_82, %c32_83] : memref<8x33x36xf32, #tpu.memory_space<vmem>>, vector<1x32x4xf32>
    %158 = vector.shape_cast %157 : vector<1x32x4xf32> to vector<32x4xf32>
    %cst_84 = arith.constant dense<0.000000e+00> : vector<8x4xf32>
    %159 = tpu.matmul %156, %158, %cst_84 {dimension_numbers = #tpu.dot_dimension_numbers<[1], [0], [0], [1], [0, 0, 1, 1], [], []>} : vector<8x32xf32>, vector<32x4xf32>, vector<8x4xf32> -> vector<8x4xf32>
    %c2_85 = arith.constant 2 : index
    %c32_86 = arith.constant 32 : index
    %c32_87 = arith.constant 32 : index
    %160 = vector.load %arg5[%c2_85, %c32_86, %c32_87] : memref<8x33x36xf32, #tpu.memory_space<vmem>>, vector<1x1x4xf32>
    %161 = vector.shape_cast %160 : vector<1x1x4xf32> to vector<1x4xf32>
    %162 = vector.broadcast %161 : vector<1x4xf32> to vector<8x4xf32>
    %163 = arith.addf %159, %162 : vector<8x4xf32>
    %164 = arith.negf %163 : vector<8x4xf32>
    %165 = math.exp %164 : vector<8x4xf32>
    %cst_88 = arith.constant 1.000000e+00 : f32
    %166 = vector.broadcast %cst_88 : f32 to vector<8x4xf32>
    %167 = arith.addf %166, %165 : vector<8x4xf32>
    %168 = arith.divf %166, %167 : vector<8x4xf32>
    %c0_89 = arith.constant 0 : index
    %c8 = arith.constant 8 : index
    %169 = vector.load %arg8[%c0_89, %c8] : memref<8x32xf32, #tpu.memory_space<vmem>>, vector<8x4xf32>
    tpu.vector_store %arg8[%c0_89, %c8], %168 {strides = array<i32>} : memref<8x32xf32, #tpu.memory_space<vmem>>, vector<8x4xf32>,
    %c3 = arith.constant 3 : index
    %c0_90 = arith.constant 0 : index
    %c0_91 = arith.constant 0 : index
    %170 = vector.load %arg4[%c3, %c0_90, %c0_91] : memref<8x33x96xf32, #tpu.memory_space<vmem>>, vector<1x32x96xf32>
    %171 = vector.shape_cast %170 : vector<1x32x96xf32> to vector<32x96xf32>
    %cst_92 = arith.constant dense<0.000000e+00> : vector<8x96xf32>
    %172 = tpu.matmul %147, %171, %cst_92 {dimension_numbers = #tpu.dot_dimension_numbers<[1], [0], [0], [1], [0, 0, 1, 1], [], []>} : vector<8x32xf32>, vector<32x96xf32>, vector<8x96xf32> -> vector<8x96xf32>
    %c3_93 = arith.constant 3 : index
    %c32_94 = arith.constant 32 : index
    %c0_95 = arith.constant 0 : index
    %173 = vector.load %arg4[%c3_93, %c32_94, %c0_95] : memref<8x33x96xf32, #tpu.memory_space<vmem>>, vector<1x1x96xf32>
    %174 = vector.shape_cast %173 : vector<1x1x96xf32> to vector<1x96xf32>
    %175 = vector.broadcast %174 : vector<1x96xf32> to vector<8x96xf32>
    %176 = arith.addf %172, %175 : vector<8x96xf32>
    %177 = vector.extract_strided_slice %9 {offsets = [0, 384], sizes = [8, 64], strides = [1, 1]} : vector<8x1024xf32> to vector<8x64xf32>
    %178 = vector.extract_strided_slice %176 {offsets = [0, 0], sizes = [8, 64], strides = [1, 1]} : vector<8x96xf32> to vector<8x64xf32>
    %179 = arith.addf %177, %178 : vector<8x64xf32>
    %180 = arith.negf %179 : vector<8x64xf32>
    %181 = math.exp %180 : vector<8x64xf32>
    %cst_96 = arith.constant 1.000000e+00 : f32
    %182 = vector.broadcast %cst_96 : f32 to vector<8x64xf32>
    %183 = arith.addf %182, %181 : vector<8x64xf32>
    %184 = arith.divf %182, %183 : vector<8x64xf32>
    %185 = vector.extract_strided_slice %184 {offsets = [0, 0], sizes = [8, 32], strides = [1, 1]} : vector<8x64xf32> to vector<8x32xf32>
    %186 = vector.extract_strided_slice %184 {offsets = [0, 32], sizes = [8, 32], strides = [1, 1]} : vector<8x64xf32> to vector<8x32xf32>
    %187 = vector.extract_strided_slice %9 {offsets = [0, 448], sizes = [8, 32], strides = [1, 1]} : vector<8x1024xf32> to vector<8x32xf32>
    %188 = vector.extract_strided_slice %176 {offsets = [0, 64], sizes = [8, 32], strides = [1, 1]} : vector<8x96xf32> to vector<8x32xf32>
    %189 = arith.mulf %185, %188 : vector<8x32xf32>
    %190 = arith.addf %187, %189 : vector<8x32xf32>
    %191 = math.tanh %190 : vector<8x32xf32>
    %cst_97 = arith.constant 1.000000e+00 : f32
    %192 = vector.broadcast %cst_97 : f32 to vector<8x32xf32>
    %193 = arith.subf %192, %186 : vector<8x32xf32>
    %194 = arith.mulf %193, %191 : vector<8x32xf32>
    %195 = arith.mulf %186, %147 : vector<8x32xf32>
    %196 = arith.addf %194, %195 : vector<8x32xf32>
    %197 = vector.extract_strided_slice %12 {offsets = [3, 0, 0], sizes = [1, 8, 32], strides = [1, 1, 1]} : vector<8x8x32xf32> to vector<1x8x32xf32>
    %198 = vector.shape_cast %197 : vector<1x8x32xf32> to vector<8x32xf32>
    %199 = arith.addf %196, %198 : vector<8x32xf32>
    %c3_98 = arith.constant 3 : index
    %c0_99 = arith.constant 0 : index
    %c0_100 = arith.constant 0 : index
    %200 = vector.load %arg5[%c3_98, %c0_99, %c0_100] : memref<8x33x36xf32, #tpu.memory_space<vmem>>, vector<1x32x32xf32>
    %201 = vector.shape_cast %200 : vector<1x32x32xf32> to vector<32x32xf32>
    %cst_101 = arith.constant dense<0.000000e+00> : vector<8x32xf32>
    %202 = tpu.matmul %199, %201, %cst_101 {dimension_numbers = #tpu.dot_dimension_numbers<[1], [0], [0], [1], [0, 0, 1, 1], [], []>} : vector<8x32xf32>, vector<32x32xf32>, vector<8x32xf32> -> vector<8x32xf32>
    %c3_102 = arith.constant 3 : index
    %c32_103 = arith.constant 32 : index
    %c0_104 = arith.constant 0 : index
    %203 = vector.load %arg5[%c3_102, %c32_103, %c0_104] : memref<8x33x36xf32, #tpu.memory_space<vmem>>, vector<1x1x32xf32>
    %204 = vector.shape_cast %203 : vector<1x1x32xf32> to vector<1x32xf32>
    %205 = vector.broadcast %204 : vector<1x32xf32> to vector<8x32xf32>
    %206 = arith.addf %202, %205 : vector<8x32xf32>
    %cst_105 = arith.constant 0.000000e+00 : f32
    %207 = vector.broadcast %cst_105 : f32 to vector<8x32xf32>
    %208 = arith.maximumf %206, %207 : vector<8x32xf32>
    %c3_106 = arith.constant 3 : index
    %c0_107 = arith.constant 0 : index
    %c32_108 = arith.constant 32 : index
    %209 = vector.load %arg5[%c3_106, %c0_107, %c32_108] : memref<8x33x36xf32, #tpu.memory_space<vmem>>, vector<1x32x4xf32>
    %210 = vector.shape_cast %209 : vector<1x32x4xf32> to vector<32x4xf32>
    %cst_109 = arith.constant dense<0.000000e+00> : vector<8x4xf32>
    %211 = tpu.matmul %208, %210, %cst_109 {dimension_numbers = #tpu.dot_dimension_numbers<[1], [0], [0], [1], [0, 0, 1, 1], [], []>} : vector<8x32xf32>, vector<32x4xf32>, vector<8x4xf32> -> vector<8x4xf32>
    %c3_110 = arith.constant 3 : index
    %c32_111 = arith.constant 32 : index
    %c32_112 = arith.constant 32 : index
    %212 = vector.load %arg5[%c3_110, %c32_111, %c32_112] : memref<8x33x36xf32, #tpu.memory_space<vmem>>, vector<1x1x4xf32>
    %213 = vector.shape_cast %212 : vector<1x1x4xf32> to vector<1x4xf32>
    %214 = vector.broadcast %213 : vector<1x4xf32> to vector<8x4xf32>
    %215 = arith.addf %211, %214 : vector<8x4xf32>
    %216 = arith.negf %215 : vector<8x4xf32>
    %217 = math.exp %216 : vector<8x4xf32>
    %cst_113 = arith.constant 1.000000e+00 : f32
    %218 = vector.broadcast %cst_113 : f32 to vector<8x4xf32>
    %219 = arith.addf %218, %217 : vector<8x4xf32>
    %220 = arith.divf %218, %219 : vector<8x4xf32>
    %c0_114 = arith.constant 0 : index
    %c12_115 = arith.constant 12 : index
    %221 = vector.load %arg8[%c0_114, %c12_115] : memref<8x32xf32, #tpu.memory_space<vmem>>, vector<8x4xf32>
    tpu.vector_store %arg8[%c0_114, %c12_115], %220 {strides = array<i32>} : memref<8x32xf32, #tpu.memory_space<vmem>>, vector<8x4xf32>,
    %c4_116 = arith.constant 4 : index
    %c0_117 = arith.constant 0 : index
    %c0_118 = arith.constant 0 : index
    %222 = vector.load %arg4[%c4_116, %c0_117, %c0_118] : memref<8x33x96xf32, #tpu.memory_space<vmem>>, vector<1x32x96xf32>
    %223 = vector.shape_cast %222 : vector<1x32x96xf32> to vector<32x96xf32>
    %cst_119 = arith.constant dense<0.000000e+00> : vector<8x96xf32>
    %224 = tpu.matmul %199, %223, %cst_119 {dimension_numbers = #tpu.dot_dimension_numbers<[1], [0], [0], [1], [0, 0, 1, 1], [], []>} : vector<8x32xf32>, vector<32x96xf32>, vector<8x96xf32> -> vector<8x96xf32>
    %c4_120 = arith.constant 4 : index
    %c32_121 = arith.constant 32 : index
    %c0_122 = arith.constant 0 : index
    %225 = vector.load %arg4[%c4_120, %c32_121, %c0_122] : memref<8x33x96xf32, #tpu.memory_space<vmem>>, vector<1x1x96xf32>
    %226 = vector.shape_cast %225 : vector<1x1x96xf32> to vector<1x96xf32>
    %227 = vector.broadcast %226 : vector<1x96xf32> to vector<8x96xf32>
    %228 = arith.addf %224, %227 : vector<8x96xf32>
    %229 = vector.extract_strided_slice %9 {offsets = [0, 512], sizes = [8, 64], strides = [1, 1]} : vector<8x1024xf32> to vector<8x64xf32>
    %230 = vector.extract_strided_slice %228 {offsets = [0, 0], sizes = [8, 64], strides = [1, 1]} : vector<8x96xf32> to vector<8x64xf32>
    %231 = arith.addf %229, %230 : vector<8x64xf32>
    %232 = arith.negf %231 : vector<8x64xf32>
    %233 = math.exp %232 : vector<8x64xf32>
    %cst_123 = arith.constant 1.000000e+00 : f32
    %234 = vector.broadcast %cst_123 : f32 to vector<8x64xf32>
    %235 = arith.addf %234, %233 : vector<8x64xf32>
    %236 = arith.divf %234, %235 : vector<8x64xf32>
    %237 = vector.extract_strided_slice %236 {offsets = [0, 0], sizes = [8, 32], strides = [1, 1]} : vector<8x64xf32> to vector<8x32xf32>
    %238 = vector.extract_strided_slice %236 {offsets = [0, 32], sizes = [8, 32], strides = [1, 1]} : vector<8x64xf32> to vector<8x32xf32>
    %239 = vector.extract_strided_slice %9 {offsets = [0, 576], sizes = [8, 32], strides = [1, 1]} : vector<8x1024xf32> to vector<8x32xf32>
    %240 = vector.extract_strided_slice %228 {offsets = [0, 64], sizes = [8, 32], strides = [1, 1]} : vector<8x96xf32> to vector<8x32xf32>
    %241 = arith.mulf %237, %240 : vector<8x32xf32>
    %242 = arith.addf %239, %241 : vector<8x32xf32>
    %243 = math.tanh %242 : vector<8x32xf32>
    %cst_124 = arith.constant 1.000000e+00 : f32
    %244 = vector.broadcast %cst_124 : f32 to vector<8x32xf32>
    %245 = arith.subf %244, %238 : vector<8x32xf32>
    %246 = arith.mulf %245, %243 : vector<8x32xf32>
    %247 = arith.mulf %238, %199 : vector<8x32xf32>
    %248 = arith.addf %246, %247 : vector<8x32xf32>
    %249 = vector.extract_strided_slice %12 {offsets = [4, 0, 0], sizes = [1, 8, 32], strides = [1, 1, 1]} : vector<8x8x32xf32> to vector<1x8x32xf32>
    %250 = vector.shape_cast %249 : vector<1x8x32xf32> to vector<8x32xf32>
    %251 = arith.addf %248, %250 : vector<8x32xf32>
    %c4_125 = arith.constant 4 : index
    %c0_126 = arith.constant 0 : index
    %c0_127 = arith.constant 0 : index
    %252 = vector.load %arg5[%c4_125, %c0_126, %c0_127] : memref<8x33x36xf32, #tpu.memory_space<vmem>>, vector<1x32x32xf32>
    %253 = vector.shape_cast %252 : vector<1x32x32xf32> to vector<32x32xf32>
    %cst_128 = arith.constant dense<0.000000e+00> : vector<8x32xf32>
    %254 = tpu.matmul %251, %253, %cst_128 {dimension_numbers = #tpu.dot_dimension_numbers<[1], [0], [0], [1], [0, 0, 1, 1], [], []>} : vector<8x32xf32>, vector<32x32xf32>, vector<8x32xf32> -> vector<8x32xf32>
    %c4_129 = arith.constant 4 : index
    %c32_130 = arith.constant 32 : index
    %c0_131 = arith.constant 0 : index
    %255 = vector.load %arg5[%c4_129, %c32_130, %c0_131] : memref<8x33x36xf32, #tpu.memory_space<vmem>>, vector<1x1x32xf32>
    %256 = vector.shape_cast %255 : vector<1x1x32xf32> to vector<1x32xf32>
    %257 = vector.broadcast %256 : vector<1x32xf32> to vector<8x32xf32>
    %258 = arith.addf %254, %257 : vector<8x32xf32>
    %cst_132 = arith.constant 0.000000e+00 : f32
    %259 = vector.broadcast %cst_132 : f32 to vector<8x32xf32>
    %260 = arith.maximumf %258, %259 : vector<8x32xf32>
    %c4_133 = arith.constant 4 : index
    %c0_134 = arith.constant 0 : index
    %c32_135 = arith.constant 32 : index
    %261 = vector.load %arg5[%c4_133, %c0_134, %c32_135] : memref<8x33x36xf32, #tpu.memory_space<vmem>>, vector<1x32x4xf32>
    %262 = vector.shape_cast %261 : vector<1x32x4xf32> to vector<32x4xf32>
    %cst_136 = arith.constant dense<0.000000e+00> : vector<8x4xf32>
    %263 = tpu.matmul %260, %262, %cst_136 {dimension_numbers = #tpu.dot_dimension_numbers<[1], [0], [0], [1], [0, 0, 1, 1], [], []>} : vector<8x32xf32>, vector<32x4xf32>, vector<8x4xf32> -> vector<8x4xf32>
    %c4_137 = arith.constant 4 : index
    %c32_138 = arith.constant 32 : index
    %c32_139 = arith.constant 32 : index
    %264 = vector.load %arg5[%c4_137, %c32_138, %c32_139] : memref<8x33x36xf32, #tpu.memory_space<vmem>>, vector<1x1x4xf32>
    %265 = vector.shape_cast %264 : vector<1x1x4xf32> to vector<1x4xf32>
    %266 = vector.broadcast %265 : vector<1x4xf32> to vector<8x4xf32>
    %267 = arith.addf %263, %266 : vector<8x4xf32>
    %268 = arith.negf %267 : vector<8x4xf32>
    %269 = math.exp %268 : vector<8x4xf32>
    %cst_140 = arith.constant 1.000000e+00 : f32
    %270 = vector.broadcast %cst_140 : f32 to vector<8x4xf32>
    %271 = arith.addf %270, %269 : vector<8x4xf32>
    %272 = arith.divf %270, %271 : vector<8x4xf32>
    %c0_141 = arith.constant 0 : index
    %c16 = arith.constant 16 : index
    %273 = vector.load %arg8[%c0_141, %c16] : memref<8x32xf32, #tpu.memory_space<vmem>>, vector<8x4xf32>
    tpu.vector_store %arg8[%c0_141, %c16], %272 {strides = array<i32>} : memref<8x32xf32, #tpu.memory_space<vmem>>, vector<8x4xf32>,
    %c5 = arith.constant 5 : index
    %c0_142 = arith.constant 0 : index
    %c0_143 = arith.constant 0 : index
    %274 = vector.load %arg4[%c5, %c0_142, %c0_143] : memref<8x33x96xf32, #tpu.memory_space<vmem>>, vector<1x32x96xf32>
    %275 = vector.shape_cast %274 : vector<1x32x96xf32> to vector<32x96xf32>
    %cst_144 = arith.constant dense<0.000000e+00> : vector<8x96xf32>
    %276 = tpu.matmul %251, %275, %cst_144 {dimension_numbers = #tpu.dot_dimension_numbers<[1], [0], [0], [1], [0, 0, 1, 1], [], []>} : vector<8x32xf32>, vector<32x96xf32>, vector<8x96xf32> -> vector<8x96xf32>
    %c5_145 = arith.constant 5 : index
    %c32_146 = arith.constant 32 : index
    %c0_147 = arith.constant 0 : index
    %277 = vector.load %arg4[%c5_145, %c32_146, %c0_147] : memref<8x33x96xf32, #tpu.memory_space<vmem>>, vector<1x1x96xf32>
    %278 = vector.shape_cast %277 : vector<1x1x96xf32> to vector<1x96xf32>
    %279 = vector.broadcast %278 : vector<1x96xf32> to vector<8x96xf32>
    %280 = arith.addf %276, %279 : vector<8x96xf32>
    %281 = vector.extract_strided_slice %9 {offsets = [0, 640], sizes = [8, 64], strides = [1, 1]} : vector<8x1024xf32> to vector<8x64xf32>
    %282 = vector.extract_strided_slice %280 {offsets = [0, 0], sizes = [8, 64], strides = [1, 1]} : vector<8x96xf32> to vector<8x64xf32>
    %283 = arith.addf %281, %282 : vector<8x64xf32>
    %284 = arith.negf %283 : vector<8x64xf32>
    %285 = math.exp %284 : vector<8x64xf32>
    %cst_148 = arith.constant 1.000000e+00 : f32
    %286 = vector.broadcast %cst_148 : f32 to vector<8x64xf32>
    %287 = arith.addf %286, %285 : vector<8x64xf32>
    %288 = arith.divf %286, %287 : vector<8x64xf32>
    %289 = vector.extract_strided_slice %288 {offsets = [0, 0], sizes = [8, 32], strides = [1, 1]} : vector<8x64xf32> to vector<8x32xf32>
    %290 = vector.extract_strided_slice %288 {offsets = [0, 32], sizes = [8, 32], strides = [1, 1]} : vector<8x64xf32> to vector<8x32xf32>
    %291 = vector.extract_strided_slice %9 {offsets = [0, 704], sizes = [8, 32], strides = [1, 1]} : vector<8x1024xf32> to vector<8x32xf32>
    %292 = vector.extract_strided_slice %280 {offsets = [0, 64], sizes = [8, 32], strides = [1, 1]} : vector<8x96xf32> to vector<8x32xf32>
    %293 = arith.mulf %289, %292 : vector<8x32xf32>
    %294 = arith.addf %291, %293 : vector<8x32xf32>
    %295 = math.tanh %294 : vector<8x32xf32>
    %cst_149 = arith.constant 1.000000e+00 : f32
    %296 = vector.broadcast %cst_149 : f32 to vector<8x32xf32>
    %297 = arith.subf %296, %290 : vector<8x32xf32>
    %298 = arith.mulf %297, %295 : vector<8x32xf32>
    %299 = arith.mulf %290, %251 : vector<8x32xf32>
    %300 = arith.addf %298, %299 : vector<8x32xf32>
    %301 = vector.extract_strided_slice %12 {offsets = [5, 0, 0], sizes = [1, 8, 32], strides = [1, 1, 1]} : vector<8x8x32xf32> to vector<1x8x32xf32>
    %302 = vector.shape_cast %301 : vector<1x8x32xf32> to vector<8x32xf32>
    %303 = arith.addf %300, %302 : vector<8x32xf32>
    %c5_150 = arith.constant 5 : index
    %c0_151 = arith.constant 0 : index
    %c0_152 = arith.constant 0 : index
    %304 = vector.load %arg5[%c5_150, %c0_151, %c0_152] : memref<8x33x36xf32, #tpu.memory_space<vmem>>, vector<1x32x32xf32>
    %305 = vector.shape_cast %304 : vector<1x32x32xf32> to vector<32x32xf32>
    %cst_153 = arith.constant dense<0.000000e+00> : vector<8x32xf32>
    %306 = tpu.matmul %303, %305, %cst_153 {dimension_numbers = #tpu.dot_dimension_numbers<[1], [0], [0], [1], [0, 0, 1, 1], [], []>} : vector<8x32xf32>, vector<32x32xf32>, vector<8x32xf32> -> vector<8x32xf32>
    %c5_154 = arith.constant 5 : index
    %c32_155 = arith.constant 32 : index
    %c0_156 = arith.constant 0 : index
    %307 = vector.load %arg5[%c5_154, %c32_155, %c0_156] : memref<8x33x36xf32, #tpu.memory_space<vmem>>, vector<1x1x32xf32>
    %308 = vector.shape_cast %307 : vector<1x1x32xf32> to vector<1x32xf32>
    %309 = vector.broadcast %308 : vector<1x32xf32> to vector<8x32xf32>
    %310 = arith.addf %306, %309 : vector<8x32xf32>
    %cst_157 = arith.constant 0.000000e+00 : f32
    %311 = vector.broadcast %cst_157 : f32 to vector<8x32xf32>
    %312 = arith.maximumf %310, %311 : vector<8x32xf32>
    %c5_158 = arith.constant 5 : index
    %c0_159 = arith.constant 0 : index
    %c32_160 = arith.constant 32 : index
    %313 = vector.load %arg5[%c5_158, %c0_159, %c32_160] : memref<8x33x36xf32, #tpu.memory_space<vmem>>, vector<1x32x4xf32>
    %314 = vector.shape_cast %313 : vector<1x32x4xf32> to vector<32x4xf32>
    %cst_161 = arith.constant dense<0.000000e+00> : vector<8x4xf32>
    %315 = tpu.matmul %312, %314, %cst_161 {dimension_numbers = #tpu.dot_dimension_numbers<[1], [0], [0], [1], [0, 0, 1, 1], [], []>} : vector<8x32xf32>, vector<32x4xf32>, vector<8x4xf32> -> vector<8x4xf32>
    %c5_162 = arith.constant 5 : index
    %c32_163 = arith.constant 32 : index
    %c32_164 = arith.constant 32 : index
    %316 = vector.load %arg5[%c5_162, %c32_163, %c32_164] : memref<8x33x36xf32, #tpu.memory_space<vmem>>, vector<1x1x4xf32>
    %317 = vector.shape_cast %316 : vector<1x1x4xf32> to vector<1x4xf32>
    %318 = vector.broadcast %317 : vector<1x4xf32> to vector<8x4xf32>
    %319 = arith.addf %315, %318 : vector<8x4xf32>
    %320 = arith.negf %319 : vector<8x4xf32>
    %321 = math.exp %320 : vector<8x4xf32>
    %cst_165 = arith.constant 1.000000e+00 : f32
    %322 = vector.broadcast %cst_165 : f32 to vector<8x4xf32>
    %323 = arith.addf %322, %321 : vector<8x4xf32>
    %324 = arith.divf %322, %323 : vector<8x4xf32>
    %c0_166 = arith.constant 0 : index
    %c20 = arith.constant 20 : index
    %325 = vector.load %arg8[%c0_166, %c20] : memref<8x32xf32, #tpu.memory_space<vmem>>, vector<8x4xf32>
    tpu.vector_store %arg8[%c0_166, %c20], %324 {strides = array<i32>} : memref<8x32xf32, #tpu.memory_space<vmem>>, vector<8x4xf32>,
    %c6 = arith.constant 6 : index
    %c0_167 = arith.constant 0 : index
    %c0_168 = arith.constant 0 : index
    %326 = vector.load %arg4[%c6, %c0_167, %c0_168] : memref<8x33x96xf32, #tpu.memory_space<vmem>>, vector<1x32x96xf32>
    %327 = vector.shape_cast %326 : vector<1x32x96xf32> to vector<32x96xf32>
    %cst_169 = arith.constant dense<0.000000e+00> : vector<8x96xf32>
    %328 = tpu.matmul %303, %327, %cst_169 {dimension_numbers = #tpu.dot_dimension_numbers<[1], [0], [0], [1], [0, 0, 1, 1], [], []>} : vector<8x32xf32>, vector<32x96xf32>, vector<8x96xf32> -> vector<8x96xf32>
    %c6_170 = arith.constant 6 : index
    %c32_171 = arith.constant 32 : index
    %c0_172 = arith.constant 0 : index
    %329 = vector.load %arg4[%c6_170, %c32_171, %c0_172] : memref<8x33x96xf32, #tpu.memory_space<vmem>>, vector<1x1x96xf32>
    %330 = vector.shape_cast %329 : vector<1x1x96xf32> to vector<1x96xf32>
    %331 = vector.broadcast %330 : vector<1x96xf32> to vector<8x96xf32>
    %332 = arith.addf %328, %331 : vector<8x96xf32>
    %333 = vector.extract_strided_slice %9 {offsets = [0, 768], sizes = [8, 64], strides = [1, 1]} : vector<8x1024xf32> to vector<8x64xf32>
    %334 = vector.extract_strided_slice %332 {offsets = [0, 0], sizes = [8, 64], strides = [1, 1]} : vector<8x96xf32> to vector<8x64xf32>
    %335 = arith.addf %333, %334 : vector<8x64xf32>
    %336 = arith.negf %335 : vector<8x64xf32>
    %337 = math.exp %336 : vector<8x64xf32>
    %cst_173 = arith.constant 1.000000e+00 : f32
    %338 = vector.broadcast %cst_173 : f32 to vector<8x64xf32>
    %339 = arith.addf %338, %337 : vector<8x64xf32>
    %340 = arith.divf %338, %339 : vector<8x64xf32>
    %341 = vector.extract_strided_slice %340 {offsets = [0, 0], sizes = [8, 32], strides = [1, 1]} : vector<8x64xf32> to vector<8x32xf32>
    %342 = vector.extract_strided_slice %340 {offsets = [0, 32], sizes = [8, 32], strides = [1, 1]} : vector<8x64xf32> to vector<8x32xf32>
    %343 = vector.extract_strided_slice %9 {offsets = [0, 832], sizes = [8, 32], strides = [1, 1]} : vector<8x1024xf32> to vector<8x32xf32>
    %344 = vector.extract_strided_slice %332 {offsets = [0, 64], sizes = [8, 32], strides = [1, 1]} : vector<8x96xf32> to vector<8x32xf32>
    %345 = arith.mulf %341, %344 : vector<8x32xf32>
    %346 = arith.addf %343, %345 : vector<8x32xf32>
    %347 = math.tanh %346 : vector<8x32xf32>
    %cst_174 = arith.constant 1.000000e+00 : f32
    %348 = vector.broadcast %cst_174 : f32 to vector<8x32xf32>
    %349 = arith.subf %348, %342 : vector<8x32xf32>
    %350 = arith.mulf %349, %347 : vector<8x32xf32>
    %351 = arith.mulf %342, %303 : vector<8x32xf32>
    %352 = arith.addf %350, %351 : vector<8x32xf32>
    %353 = vector.extract_strided_slice %12 {offsets = [6, 0, 0], sizes = [1, 8, 32], strides = [1, 1, 1]} : vector<8x8x32xf32> to vector<1x8x32xf32>
    %354 = vector.shape_cast %353 : vector<1x8x32xf32> to vector<8x32xf32>
    %355 = arith.addf %352, %354 : vector<8x32xf32>
    %c6_175 = arith.constant 6 : index
    %c0_176 = arith.constant 0 : index
    %c0_177 = arith.constant 0 : index
    %356 = vector.load %arg5[%c6_175, %c0_176, %c0_177] : memref<8x33x36xf32, #tpu.memory_space<vmem>>, vector<1x32x32xf32>
    %357 = vector.shape_cast %356 : vector<1x32x32xf32> to vector<32x32xf32>
    %cst_178 = arith.constant dense<0.000000e+00> : vector<8x32xf32>
    %358 = tpu.matmul %355, %357, %cst_178 {dimension_numbers = #tpu.dot_dimension_numbers<[1], [0], [0], [1], [0, 0, 1, 1], [], []>} : vector<8x32xf32>, vector<32x32xf32>, vector<8x32xf32> -> vector<8x32xf32>
    %c6_179 = arith.constant 6 : index
    %c32_180 = arith.constant 32 : index
    %c0_181 = arith.constant 0 : index
    %359 = vector.load %arg5[%c6_179, %c32_180, %c0_181] : memref<8x33x36xf32, #tpu.memory_space<vmem>>, vector<1x1x32xf32>
    %360 = vector.shape_cast %359 : vector<1x1x32xf32> to vector<1x32xf32>
    %361 = vector.broadcast %360 : vector<1x32xf32> to vector<8x32xf32>
    %362 = arith.addf %358, %361 : vector<8x32xf32>
    %cst_182 = arith.constant 0.000000e+00 : f32
    %363 = vector.broadcast %cst_182 : f32 to vector<8x32xf32>
    %364 = arith.maximumf %362, %363 : vector<8x32xf32>
    %c6_183 = arith.constant 6 : index
    %c0_184 = arith.constant 0 : index
    %c32_185 = arith.constant 32 : index
    %365 = vector.load %arg5[%c6_183, %c0_184, %c32_185] : memref<8x33x36xf32, #tpu.memory_space<vmem>>, vector<1x32x4xf32>
    %366 = vector.shape_cast %365 : vector<1x32x4xf32> to vector<32x4xf32>
    %cst_186 = arith.constant dense<0.000000e+00> : vector<8x4xf32>
    %367 = tpu.matmul %364, %366, %cst_186 {dimension_numbers = #tpu.dot_dimension_numbers<[1], [0], [0], [1], [0, 0, 1, 1], [], []>} : vector<8x32xf32>, vector<32x4xf32>, vector<8x4xf32> -> vector<8x4xf32>
    %c6_187 = arith.constant 6 : index
    %c32_188 = arith.constant 32 : index
    %c32_189 = arith.constant 32 : index
    %368 = vector.load %arg5[%c6_187, %c32_188, %c32_189] : memref<8x33x36xf32, #tpu.memory_space<vmem>>, vector<1x1x4xf32>
    %369 = vector.shape_cast %368 : vector<1x1x4xf32> to vector<1x4xf32>
    %370 = vector.broadcast %369 : vector<1x4xf32> to vector<8x4xf32>
    %371 = arith.addf %367, %370 : vector<8x4xf32>
    %372 = arith.negf %371 : vector<8x4xf32>
    %373 = math.exp %372 : vector<8x4xf32>
    %cst_190 = arith.constant 1.000000e+00 : f32
    %374 = vector.broadcast %cst_190 : f32 to vector<8x4xf32>
    %375 = arith.addf %374, %373 : vector<8x4xf32>
    %376 = arith.divf %374, %375 : vector<8x4xf32>
    %c0_191 = arith.constant 0 : index
    %c24 = arith.constant 24 : index
    %377 = vector.load %arg8[%c0_191, %c24] : memref<8x32xf32, #tpu.memory_space<vmem>>, vector<8x4xf32>
    tpu.vector_store %arg8[%c0_191, %c24], %376 {strides = array<i32>} : memref<8x32xf32, #tpu.memory_space<vmem>>, vector<8x4xf32>,
    %c7 = arith.constant 7 : index
    %c0_192 = arith.constant 0 : index
    %c0_193 = arith.constant 0 : index
    %378 = vector.load %arg4[%c7, %c0_192, %c0_193] : memref<8x33x96xf32, #tpu.memory_space<vmem>>, vector<1x32x96xf32>
    %379 = vector.shape_cast %378 : vector<1x32x96xf32> to vector<32x96xf32>
    %cst_194 = arith.constant dense<0.000000e+00> : vector<8x96xf32>
    %380 = tpu.matmul %355, %379, %cst_194 {dimension_numbers = #tpu.dot_dimension_numbers<[1], [0], [0], [1], [0, 0, 1, 1], [], []>} : vector<8x32xf32>, vector<32x96xf32>, vector<8x96xf32> -> vector<8x96xf32>
    %c7_195 = arith.constant 7 : index
    %c32_196 = arith.constant 32 : index
    %c0_197 = arith.constant 0 : index
    %381 = vector.load %arg4[%c7_195, %c32_196, %c0_197] : memref<8x33x96xf32, #tpu.memory_space<vmem>>, vector<1x1x96xf32>
    %382 = vector.shape_cast %381 : vector<1x1x96xf32> to vector<1x96xf32>
    %383 = vector.broadcast %382 : vector<1x96xf32> to vector<8x96xf32>
    %384 = arith.addf %380, %383 : vector<8x96xf32>
    %385 = vector.extract_strided_slice %9 {offsets = [0, 896], sizes = [8, 64], strides = [1, 1]} : vector<8x1024xf32> to vector<8x64xf32>
    %386 = vector.extract_strided_slice %384 {offsets = [0, 0], sizes = [8, 64], strides = [1, 1]} : vector<8x96xf32> to vector<8x64xf32>
    %387 = arith.addf %385, %386 : vector<8x64xf32>
    %388 = arith.negf %387 : vector<8x64xf32>
    %389 = math.exp %388 : vector<8x64xf32>
    %cst_198 = arith.constant 1.000000e+00 : f32
    %390 = vector.broadcast %cst_198 : f32 to vector<8x64xf32>
    %391 = arith.addf %390, %389 : vector<8x64xf32>
    %392 = arith.divf %390, %391 : vector<8x64xf32>
    %393 = vector.extract_strided_slice %392 {offsets = [0, 0], sizes = [8, 32], strides = [1, 1]} : vector<8x64xf32> to vector<8x32xf32>
    %394 = vector.extract_strided_slice %392 {offsets = [0, 32], sizes = [8, 32], strides = [1, 1]} : vector<8x64xf32> to vector<8x32xf32>
    %395 = vector.extract_strided_slice %9 {offsets = [0, 960], sizes = [8, 32], strides = [1, 1]} : vector<8x1024xf32> to vector<8x32xf32>
    %396 = vector.extract_strided_slice %384 {offsets = [0, 64], sizes = [8, 32], strides = [1, 1]} : vector<8x96xf32> to vector<8x32xf32>
    %397 = arith.mulf %393, %396 : vector<8x32xf32>
    %398 = arith.addf %395, %397 : vector<8x32xf32>
    %399 = math.tanh %398 : vector<8x32xf32>
    %cst_199 = arith.constant 1.000000e+00 : f32
    %400 = vector.broadcast %cst_199 : f32 to vector<8x32xf32>
    %401 = arith.subf %400, %394 : vector<8x32xf32>
    %402 = arith.mulf %401, %399 : vector<8x32xf32>
    %403 = arith.mulf %394, %355 : vector<8x32xf32>
    %404 = arith.addf %402, %403 : vector<8x32xf32>
    %405 = vector.extract_strided_slice %12 {offsets = [7, 0, 0], sizes = [1, 8, 32], strides = [1, 1, 1]} : vector<8x8x32xf32> to vector<1x8x32xf32>
    %406 = vector.shape_cast %405 : vector<1x8x32xf32> to vector<8x32xf32>
    %407 = arith.addf %404, %406 : vector<8x32xf32>
    %c7_200 = arith.constant 7 : index
    %c0_201 = arith.constant 0 : index
    %c0_202 = arith.constant 0 : index
    %408 = vector.load %arg5[%c7_200, %c0_201, %c0_202] : memref<8x33x36xf32, #tpu.memory_space<vmem>>, vector<1x32x32xf32>
    %409 = vector.shape_cast %408 : vector<1x32x32xf32> to vector<32x32xf32>
    %cst_203 = arith.constant dense<0.000000e+00> : vector<8x32xf32>
    %410 = tpu.matmul %407, %409, %cst_203 {dimension_numbers = #tpu.dot_dimension_numbers<[1], [0], [0], [1], [0, 0, 1, 1], [], []>} : vector<8x32xf32>, vector<32x32xf32>, vector<8x32xf32> -> vector<8x32xf32>
    %c7_204 = arith.constant 7 : index
    %c32_205 = arith.constant 32 : index
    %c0_206 = arith.constant 0 : index
    %411 = vector.load %arg5[%c7_204, %c32_205, %c0_206] : memref<8x33x36xf32, #tpu.memory_space<vmem>>, vector<1x1x32xf32>
    %412 = vector.shape_cast %411 : vector<1x1x32xf32> to vector<1x32xf32>
    %413 = vector.broadcast %412 : vector<1x32xf32> to vector<8x32xf32>
    %414 = arith.addf %410, %413 : vector<8x32xf32>
    %cst_207 = arith.constant 0.000000e+00 : f32
    %415 = vector.broadcast %cst_207 : f32 to vector<8x32xf32>
    %416 = arith.maximumf %414, %415 : vector<8x32xf32>
    %c7_208 = arith.constant 7 : index
    %c0_209 = arith.constant 0 : index
    %c32_210 = arith.constant 32 : index
    %417 = vector.load %arg5[%c7_208, %c0_209, %c32_210] : memref<8x33x36xf32, #tpu.memory_space<vmem>>, vector<1x32x4xf32>
    %418 = vector.shape_cast %417 : vector<1x32x4xf32> to vector<32x4xf32>
    %cst_211 = arith.constant dense<0.000000e+00> : vector<8x4xf32>
    %419 = tpu.matmul %416, %418, %cst_211 {dimension_numbers = #tpu.dot_dimension_numbers<[1], [0], [0], [1], [0, 0, 1, 1], [], []>} : vector<8x32xf32>, vector<32x4xf32>, vector<8x4xf32> -> vector<8x4xf32>
    %c7_212 = arith.constant 7 : index
    %c32_213 = arith.constant 32 : index
    %c32_214 = arith.constant 32 : index
    %420 = vector.load %arg5[%c7_212, %c32_213, %c32_214] : memref<8x33x36xf32, #tpu.memory_space<vmem>>, vector<1x1x4xf32>
    %421 = vector.shape_cast %420 : vector<1x1x4xf32> to vector<1x4xf32>
    %422 = vector.broadcast %421 : vector<1x4xf32> to vector<8x4xf32>
    %423 = arith.addf %419, %422 : vector<8x4xf32>
    %424 = arith.negf %423 : vector<8x4xf32>
    %425 = math.exp %424 : vector<8x4xf32>
    %cst_215 = arith.constant 1.000000e+00 : f32
    %426 = vector.broadcast %cst_215 : f32 to vector<8x4xf32>
    %427 = arith.addf %426, %425 : vector<8x4xf32>
    %428 = arith.divf %426, %427 : vector<8x4xf32>
    %c0_216 = arith.constant 0 : index
    %c28 = arith.constant 28 : index
    %429 = vector.load %arg8[%c0_216, %c28] : memref<8x32xf32, #tpu.memory_space<vmem>>, vector<8x4xf32>
    tpu.vector_store %arg8[%c0_216, %c28], %428 {strides = array<i32>} : memref<8x32xf32, #tpu.memory_space<vmem>>, vector<8x4xf32>,
    %c0_217 = arith.constant 0 : index
    %c0_218 = arith.constant 0 : index
    %430 = vector.load %arg6[%c0_217, %c0_218] : memref<33x16xf32, #tpu.memory_space<vmem>>, vector<32x16xf32>
    %cst_219 = arith.constant dense<0.000000e+00> : vector<8x16xf32>
    %431 = tpu.matmul %407, %430, %cst_219 {dimension_numbers = #tpu.dot_dimension_numbers<[1], [0], [0], [1], [0, 0, 1, 1], [], []>} : vector<8x32xf32>, vector<32x16xf32>, vector<8x16xf32> -> vector<8x16xf32>
    %c32_220 = arith.constant 32 : index
    %c0_221 = arith.constant 0 : index
    %432 = vector.load %arg6[%c32_220, %c0_221] : memref<33x16xf32, #tpu.memory_space<vmem>>, vector<1x16xf32>
    %433 = vector.broadcast %432 : vector<1x16xf32> to vector<8x16xf32>
    %434 = arith.addf %431, %433 : vector<8x16xf32>
    %435 = arith.negf %434 : vector<8x16xf32>
    %436 = math.exp %435 : vector<8x16xf32>
    %cst_222 = arith.constant 1.000000e+00 : f32
    %437 = vector.broadcast %cst_222 : f32 to vector<8x16xf32>
    %438 = arith.addf %437, %436 : vector<8x16xf32>
    %439 = arith.divf %437, %438 : vector<8x16xf32>
    %c0_223 = arith.constant 0 : index
    %c0_224 = arith.constant 0 : index
    %440 = vector.load %arg7[%c0_223, %c0_224] : memref<8x16xf32, #tpu.memory_space<vmem>>, vector<8x16xf32>
    tpu.vector_store %arg7[%c0_223, %c0_224], %439 {strides = array<i32>} : memref<8x16xf32, #tpu.memory_space<vmem>>, vector<8x16xf32>,
    return
  }
}

</mosaic_0001>

<bundles_post_ra>
// kernel: decoder_x_forward.1
= control target key start
LH: loop header
LB: loop body
LE: loop exit
PB: predicated region body
PF: predicated region fallthrough
CT: control target
= control target key end

     0   :  { %vm71_vm0 = vcmask 1043456   ;;  %v4198_v6 = vmov 0.0   ;;  %vm104_vm1 = vcmask 64512   ;;  %vm392_vm2 = vcmask 31744   ;;  %s5057_s0 = inlined_call_operand.vmem [shape: f32[8,4], index: 0, kind: input, shape index: {}]   ;;  %s5058_s1 = inlined_call_operand.vmem [shape: f32[8,8], index: 1, kind: input, shape index: {}]   ;;  %s5059_s2 = inlined_call_operand.vmem [shape: f32[8,8,32], index: 2, kind: input, shape index: {}]   ;;  %s5060_s3 = inlined_call_operand.vmem [shape: f32[13,1024], index: 3, kind: input, shape index: {}]   ;;  %s5061_s4 = inlined_call_operand.vmem [shape: f32[8,33,96], index: 4, kind: input, shape index: {}]   ;;  %s5062_s5 = inlined_call_operand.vmem [shape: f32[8,33,36], index: 5, kind: input, shape index: {}]   ;;  %s5063_s6 = inlined_call_operand.vmem [shape: f32[33,16], index: 6, kind: input, shape index: {}]   ;;  %s5064_s7 = inlined_call_operand.hbm [shape: f32[8,16], index: 7, kind: output, shape index: {0}]   ;;  %s5065_s8 = inlined_call_operand.vmem [shape: f32[8,32], index: 8, kind: output, shape index: {1}]  }
   0x1   :  { %v44_v0 = vld [vmem:[%s5060_s3 + $0x28] sm:$0xf0]  ;;  %v52_v1 = vld [vmem:[%s5060_s3 + $0x68] sm:$0xf]  ;;  %v43_v4 = vld [vmem:[%s5060_s3 + $0x20] sm:$0xf0]  ;;  %314 = vmatprep.mubr.f32.mxu0 %v4198_v6  ;;  %172 = vmatprep.mubr.f32.mxu1 %v4198_v6 }
   0x2   :  { %v87_v2 = vrot.slane %v44_v0, 4  ;;  %v88_v3 = vrot.slane %v52_v1, 4  ;;  %v51_v5 = vld [vmem:[%s5060_s3 + $0x60] sm:$0xf]  ;;  %v84_v7 = vrot.slane %v43_v4, 4 }
   0x3   :  { %v85_v8 = vrot.slane %v51_v5, 4  ;;  %v4274_v9 = vld [vmem:[%s5058_s1] sm:$0xff]  ;;  %v32_v10 = vld [vmem:[%s5060_s3 + $0x8] sm:$0xf]  ;;  %v40_v13 = vld [vmem:[%s5060_s3 + $0x8] sm:$0xf0] }
   0x4   :  { %v89_v11 = vsel %vm71_vm0, %v87_v2, %v88_v3  ;;  %v31_v12 = vld [vmem:[%s5060_s3] sm:$0xf]  ;;  %v48_v14 = vld [vmem:[%s5060_s3 + $0x48] sm:$0xf]  ;;  %v75_v16 = vrot.slane %v40_v13, 4 }
   0x5   :  { %250 = vmatprep.subr.mxu0 %v89_v11  ;;  %v86_v15 = vsel %vm71_vm0, %v84_v7, %v85_v8  ;;  %v76_v17 = vrot.slane %v48_v14, 4  ;;  %v39_v18 = vld [vmem:[%s5060_s3] sm:$0xf0]  ;;  %v47_v19 = vld [vmem:[%s5060_s3 + $0x40] sm:$0xf] }
   0x6   :  { %251 = vmatpush1.msra.mxu0 %v86_v15  ;;  %v72_v20 = vrot.slane %v39_v18, 4  ;;  %v73_v21 = vrot.slane %v47_v19, 4  ;;  %v36_v23 = vld [vmem:[%s5060_s3 + $0x28] sm:$0xf]  ;;  %v4308_v25 = vld [vmem:[%s5057_s0] sm:$0xff] }
   0x7   :  { %3293 = vmatmul.mubr.msk.f32.vlgmr.msra.gmra.mrb[0].mxu0 %vm104_vm1, %v4274_v9  ;;  %3295 = vmatprep.subr.msk.mxu0 %vm71_vm0, %v32_v10  ;;  %v77_v22 = vsel %vm71_vm0, %v75_v16, %v76_v17 }
   0x8   :  { %3296 = vmatpush1.msk.msra.mxu0 %vm71_vm0, %v31_v12  ;;  %108 = vmatprep.subr.mxu1 %v77_v22  ;;  %v74_v24 = vsel %vm71_vm0, %v72_v20, %v73_v21 }
   0x9   :  { %14 = vsyncpa [#allocation3], 0  ;;  %109 = vmatpush1.msra.mxu1 %v74_v24  ;;  %484 = vmatprep.mubr.f32.mxu0 %v4198_v6  ;;  %v35_v26 = vld [vmem:[%s5060_s3 + $0x20] sm:$0xf]  ;;  %v774_v28 = vld [vmem:[%s5061_s4 + $0x8] sm:$0xff]  ;;  %v4199_v30 = vmov 0.0|0.0   ;;  %v709_v46 = vlaneseq }
   0xa   :  { %v773_v27 = vld [vmem:[%s5061_s4] sm:$0xff]  ;;  %3291 = vmatmul.mubr.msk.f32.vlgmr.msra.gmra.mrb[0].mxu1 %vm104_vm1, %v4274_v9  ;;  %3301 = vmatprep.subr.msk.mxu0 %vm71_vm0, %v36_v23  ;;  %v775_v31 = vld [vmem:[%s5061_s4 + $0x10] sm:$0xff]  ;;  %v776_v32 = vld [vmem:[%s5061_s4 + $0x18] sm:$0xff]  ;;  %vm4200_vm3 = vmmov 0   ;;  %s4201_s19 = smov 64   ;;  %s4202_s21 = smov 96  }
   0xb   :  { %3297 = vmatmul.mubr.msk.f32.vlgmr.msra.gmra.mrb[2].mxu0 %vm392_vm2, %v4308_v25  ;;  %243 = vmatprep.mubr.f32.mxu1 %v4198_v6  ;;  %v3838_v29 = vpack.c.bf16 %v774_v28, %v773_v27  ;;  %v3841_v33 = vpack.c.bf16 %v776_v32, %v775_v31  ;;  %v3309_v42 = vld [vmem:[%s5061_s4 + $0x20] ss:$0 sm:$0xff]  ;;  %v4354_v47 = vshrl.u32 %v709_v46, 7  ;;  %v3307_v48 = vld [vmem:[%s5060_s3 + $0x44] ss:$8 sm:$0xf] }
   0xc   :  { %3302 = vmatpush1.msk.msra.mxu0 %vm71_vm0, %v35_v26  ;;  %626 = vmatprep.mubr.f32.mxu0 %v4198_v6  ;;  %v3308_v49 = vld [vmem:[%s5060_s3 + $0x44] ss:$8 sm:$0xf0]  ;;  %v50_v0 = vld [vmem:[%s5060_s3 + $0x58] sm:$0xf]  ;;  %s4203_s25 = smov 32  }
   0xd   :  { %3837 = vmatprep.subr.bf16.mxu0 %v4199_v30  ;;  %v4362_v50 = vor.u32 %v3308_v49, %v3307_v48  ;;  %v711_v51 = vsub.s32 0, %v4354_v47  ;;  %v42_v63 = vld [vmem:[%s5060_s3 + $0x18] sm:$0xf0]  ;;  %v41_v1 = vld [vmem:[%s5060_s3 + $0x10] sm:$0xf0]  ;;  %v82_v3 = vrot.slane %v50_v0, 4 }
   0xe   :  { %v81_v2 = vrot.slane %v42_v63, 4  ;;  %v49_v4 = vld [vmem:[%s5060_s3 + $0x50] sm:$0xf]  ;;  %v78_v5 = vrot.slane %v41_v1, 4  ;;  %v46_v8 = vld [vmem:[%s5060_s3 + $0x38] sm:$0xf0] }
   0xf   :  { %3303 = vmatmul.mubr.msk.f32.vlgmr.msra.gmra.mrb[0].mxu0 %vm392_vm2, %v4308_v25  ;;  %v712_v52 = vrot.slane %v4362_v50, %v711_v51  ;;  %v79_v7 = vrot.slane %v49_v4, 4  ;;  %v54_v10 = vld [vmem:[%s5060_s3 + $0x78] sm:$0xf]  ;;  %v93_v12 = vrot.slane %v46_v8, 4  ;;  %v45_v14 = vld [vmem:[%s5060_s3 + $0x30] sm:$0xf0] }
  0x10   :  { %3839 = vmatpush3.bf16.msra.mxu0 %v3838_v29  ;;  %3570 = vmatprep.mubr.msk.f32.mxu0 %vm4200_vm3, %v4198_v6  ;;  %v83_v11 = vsel %vm71_vm0, %v81_v2, %v82_v3  ;;  %v94_v13 = vrot.slane %v54_v10, 4  ;;  %v53_v15 = vld [vmem:[%s5060_s3 + $0x70] sm:$0xf]  ;;  %v757_v16 = vld [vmem:[%s5059_s2] sm:$0xff]  ;;  %v90_v18 = vrot.slane %v45_v14, 4  ;;  %v3315_v49 = vld [vmem:[%s5061_s4 + $0x28] sm:$0xff] }
  0x11   :  { %3840 = vmatprep.subr.bf16.mxu0 %v4199_v30  ;;  %179 = vmatprep.subr.mxu1 %v83_v11  ;;  %v80_v17 = vsel %vm71_vm0, %v78_v5, %v79_v7  ;;  %v91_v19 = vrot.slane %v53_v15, 4  ;;  %v34_v21 = vld [vmem:[%s5060_s3 + $0x18] sm:$0xf]  ;;  %v765_v24 = vmul.f32 1.0025032, %v757_v16  ;;  %v4427_v29 = vld [vmem:[%s5062_s5] sm:$0xff] }
  0x12   :  { %180 = vmatpush1.msra.mxu1 %v80_v17  ;;  %v95_v20 = vsel %vm71_vm0, %v93_v12, %v94_v13  ;;  %v33_v26 = vld [vmem:[%s5060_s3 + $0x10] sm:$0xf]  ;;  %v38_v27 = vld [vmem:[%s5060_s3 + $0x38] sm:$0xf]  ;;  %vm782_vm4 = vcmask 261120   ;;  %v715_v63 = vsub.s32 1, %v4354_v47 }
  0x13   :  { %3292 = vmatmul.mubr.msk.f32.vlgmr.msra.gmra.mrb[2].mxu1 %vm104_vm1, %v4274_v9  ;;  %321 = vmatprep.subr.mxu1 %v95_v20  ;;  %v92_v23 = vsel %vm71_vm0, %v90_v18, %v91_v19  ;;  %v37_v28 = vld [vmem:[%s5060_s3 + $0x30] sm:$0xf]  ;;  %v758_v11 = vld [vmem:[%s5059_s2 + $0x8] sm:$0xff]  ;;  %s4205_s29 = smov 12   ;;  %s4206_s30 = smov 20   ;;  %vm1372_vm5 = vcmask 64544  }
  0x14   :  { %3842 = vmatpush3.bf16.msra.mxu0 %v3841_v33  ;;  %322 = vmatpush1.msra.mxu1 %v92_v23  ;;  %v889_v32 = vld [vmem:[%s5062_s5 + $0x10] sm:$0xff]  ;;  %v890_v33 = vld [vmem:[%s5062_s5 + $0x18] sm:$0xff]  ;;  %v716_v0 = vrot.slane %v4362_v50, %v715_v63  ;;  %v766_v12 = vmul.f32 1.0025032, %v758_v11  ;;  %s4209_s28 = smov 24   ;;  %vm1674_vm6 = vcmask 97344  }
  0x15   :  { %3849 = vmatprep.subr.bf16.mxu0 %v4199_v30  ;;  %385 = vmatprep.mubr.f32.mxu1 %v4198_v6  ;;  %v3316_v51 = vld [vmem:[%s5061_s4 + $0x30] sm:$0xff]  ;;  %v4014_v13 = vpack.i.bf16 %v890_v33, %v889_v32  ;;  %vm1976_vm7 = vcmask 130144   ;;  %vm2278_vm8 = vcmask 162944   ;;  %vm2580_vm9 = vcmask 195744  }
  0x16   :  { %3298 = vmatprep.subr.msk.mxu1 %vm71_vm0, %v34_v21  ;;  %vm3271_vm10 = vcmask 130048   ;;  %vm2882_vm11 = vcmask 228544  }
  0x17   :  { %3571 = vmatmul.mubr.f32.vlgmr.msra.gmra.mrb[4].mxu0 %v4198_v6  ;;  %3294 = vmatmul.mubr.msk.f32.vlgmr.msra.gmra.mrb[4].mxu1 %vm104_vm1, %v4274_v9  ;;  %v4432_v9 = vld [vmem:[%s5062_s5 + $0x8] sm:$0xff] }
  0x18   :  { %3592 = vmatprep.mubr.msk.f32.mxu0 %vm4200_vm3, %v4198_v6  ;;  %3299 = vmatpush1.msk.msra.mxu1 %vm71_vm0, %v33_v26  ;;  %v3844_v31 = vpack.c.bf16 %v4432_v9, %v4427_v29  ;;  %v4009_v16 = vpack.i.bf16 %v4432_v9, %v4427_v29  ;;  %v3311_v29 = vld [vmem:[%s5062_s5 + $0x20] ss:$0 sm:$0xff] }
  0x19   :  { %555 = vmatprep.mubr.f32.mxu1 %v4198_v6  ;;  %3304 = vmatprep.subr.msk.mxu1 %vm71_vm0, %v38_v27 }
  0x1b   :  { %3300 = vmatmul.mubr.msk.f32.vlgmr.msra.gmra.mrb[2].mxu1 %vm392_vm2, %v4308_v25 }
  0x1c   :  { %3305 = vmatpush1.msk.msra.mxu1 %vm71_vm0, %v37_v28  ;;  %697 = vmatprep.mubr.f32.mxu1 %v4198_v6 }
  0x1d   :  { %3843 = vmatprep.subr.bf16.mxu1 %v4199_v30 }
  0x1f   :  { %3306 = vmatmul.mubr.msk.f32.vlgmr.msra.gmra.mrb[4].mxu1 %vm392_vm2, %v4308_v25 }
  0x20   :  { %3845 = vmatpush3.bf16.msra.mxu1 %v3844_v31  ;;  %3581 = vmatprep.mubr.msk.f32.mxu1 %vm4200_vm3, %v4198_v6 }
  0x21   :  { %3846 = vmatprep.subr.bf16.mxu1 %v4199_v30 }
  0xdd   :  { %v174_v34 = vpop.f32.mrb[0].mxu1 }
  0xde   :  { %v486_v35 = vpop.f32.mrb[2].mxu0  ;;  %v176_v36 = vpop.f32.mrb[1].mxu1 }
  0xdf   :  { %v487_v37 = vadd.f32 %v486_v35, %v174_v34  ;;  %v488_v38 = vpop.f32.mrb[3].mxu0  ;;  %v3847_v34 = vpack.c.bf16 %v890_v33, %v889_v32 }
  0xe0   :  { %v4344_v39 = vadd.f32 %v488_v38, %v176_v36 }
  0xe1   :  { %v749_v53 = vadd.f32 %v712_v52, %v487_v37  ;;  %3848 = vmatpush3.bf16.msra.mxu1 %v3847_v34  ;;  %v3856_v52 = vpack.c.bf16 %v3316_v51, %v3315_v49  ;;  %v3332_v49 = vld [vmem:[%s5061_s4 + $0x50] sm:$0xff]  ;;  %v3333_v51 = vld [vmem:[%s5061_s4 + $0x58] sm:$0xff] }
  0xe2   :  { %v4346_v40 = vpop.f32.mrb[0].mxu0  ;;  %3855 = vmatprep.subr.bf16.mxu1 %v4199_v30  ;;  %v750_v1 = vadd.f32 %v716_v0, %v4344_v39 }
  0xe3   :  { %v4348_v41 = vpop.f32.mrb[1].mxu0 }
  0xea   :  { %v852_v43 = vpop.f32.mrb[4].mxu0 }
  0xeb   :  { %v853_v44 = vadd.f32 %v3309_v42, %v852_v43  ;;  %v3572_v45 = vpop.f32.mrb[5].mxu0 }
  0xed   :  { %864 = vrot.lane.b32.xlu0 %v853_v44, %s4201_s19  ;;  %v856_v54 = vadd.f32 %v853_v44, %v749_v53 }
  0xee   :  { %v4456_v25 = vpop.f32.mrb[2].mxu1 }
  0xef   :  { %v3310_v55 = vmul.f32 -1.442695, %v856_v54  ;;  %v4458_v45 = vpop.f32.mrb[3].mxu1  ;;  %v3318_v54 = vld [vmem:[%s5061_s4 + $0x40] sm:$0xff] }
  0xf1   :  { %4089 = vpow2.f32 %v3310_v55 }
  0xf2   :  { %v4460_v46 = vpop.f32.mrb[4].mxu1 }
  0xf3   :  { %v4462_v48 = vpop.f32.mrb[5].mxu1 }
  0xfb   :  { %v4090_v56 = vpop.eup %4089 }
  0xfc   :  { %v860_v57 = vadd.f32 1.0, %v4090_v56 }
  0xfe   :  { %4091 = vrcp.f32 %v860_v57 }
 0x108   :  { %v4366_v58 = vpop.eup %4091 }
 0x109   :  { %v874_v35 = vsub.f32 1.0, %v4366_v58  ;;  %v880_v38 = vmul.f32 0.0, %v4366_v58 }
 0x15f   :  { %v865_v59 = vpop.permute.xlu0 %864 }
 0x160   :  { %v867_v60 = vmul.f32 %v4366_v58, %v865_v59  ;;  %v3320_v59 = vld [vmem:[%s5061_s4 + $0x48] ss:$0 sm:$0xff] }
 0x162   :  { %869 = vrot.lane.b32.xlu0 %v867_v60, %s4201_s19 }
 0x1d4   :  { %v870_v61 = vpop.permute.xlu0 %869 }
 0x1d5   :  { %v872_v62 = vadd.f32 %v870_v61, %v749_v53  ;;  %v3317_v53 = vld [vmem:[%s5061_s4 + $0x38] sm:$0xff] }
 0x1d6   :  { %v3859_v56 = vpack.c.bf16 %v3318_v54, %v3317_v53  ;;  %v3334_v53 = vld [vmem:[%s5061_s4 + $0x60] sm:$0xff]  ;;  %v3335_v54 = vld [vmem:[%s5061_s4 + $0x68] sm:$0xff] }
 0x1d7   :  { %4093 = vtanh.f32 %v872_v62 }
 0x1e1   :  { %v4094_v22 = vpop.eup %4093 }
 0x1e2   :  { %876 = vrot.lane.b32.xlu1 %v4094_v22, %s4202_s21 }
 0x1e6   :  { %883 = vrot.lane.b32.xlu1 %v765_v24, %s4203_s25 }
 0x254   :  { %v877_v36 = vpop.permute.xlu1 %876 }
 0x255   :  { %v879_v37 = vmul.f32 %v877_v36, %v874_v35  ;;  %v4512_v35 = vld [vmem:[%s5062_s5 + $0x28] sm:$0xff]  ;;  %v3324_v36 = vld [vmem:[%s5062_s5 + $0x30] sm:$0xff] }
 0x257   :  { %v881_v42 = vadd.f32 %v880_v38, %v879_v37  ;;  %v3862_v37 = vpack.c.bf16 %v3324_v36, %v4512_v35 }
 0x258   :  { %v884_v43 = vpop.permute.xlu1 %883 }
 0x259   :  { %v886_v44 = vadd.f32 %v884_v43, %v881_v42  ;;  %v3325_v42 = vld [vmem:[%s5062_s5 + $0x38] sm:$0xff]  ;;  %v3326_v43 = vld [vmem:[%s5062_s5 + $0x40] sm:$0xff] }
 0x25b   :  { %897 = vrot.lane.b32.xlu0 %v886_v44, %s4202_s21 }
 0x2cd   :  { %v898_v55 = vpop.permute.xlu0 %897 }
 0x2ce   :  { %3582 = vmatmul.mubr.msk.f32.vlgmr.msra.gmra.mrb[6].mxu1 %vm782_vm4, %v898_v55 }
 0x2cf   :  { %3857 = vmatpush3.bf16.msra.mxu1 %v3856_v52  ;;  %3603 = vmatprep.mubr.msk.f32.mxu1 %vm4200_vm3, %v4198_v6  ;;  %v3874_v52 = vpack.c.bf16 %v3333_v51, %v3332_v49  ;;  %v3349_v51 = vld [vmem:[%s5061_s4 + $0x78] sm:$0xff] }
 0x2d0   :  { %3858 = vmatprep.subr.bf16.mxu1 %v4199_v30 }
 0x2d3   :  { %3860 = vmatpush3.bf16.msra.mxu1 %v3859_v56  ;;  %v3877_v56 = vpack.c.bf16 %v3335_v54, %v3334_v53  ;;  %v3351_v54 = vld [vmem:[%s5061_s4 + $0x88] sm:$0xff] }
 0x2d4   :  { %3867 = vmatprep.subr.bf16.mxu1 %v4199_v30 }
 0x2d6   :  { %3604 = vmatmul.mubr.msk.f32.vlgmr.msra.gmra.mrb[8].mxu1 %vm782_vm4, %v898_v55 }
 0x2d7   :  { %3625 = vmatprep.mubr.msk.f32.mxu1 %vm4200_vm3, %v4198_v6 }
 0x3a1   :  { %v967_v57 = vpop.f32.mrb[6].mxu1 }
 0x3a2   :  { %v3583_v58 = vpop.f32.mrb[7].mxu1  ;;  %v968_v34 = vadd.f32 %v3311_v29, %v967_v57 }
 0x3a4   :  { %v971_v38 = vmax.f32 %v968_v34, 0.0 }
 0x3a9   :  { %v1148_v60 = vpop.f32.mrb[8].mxu1 }
 0x3aa   :  { %v1149_v61 = vadd.f32 %v3320_v59, %v1148_v60  ;;  %v3605_v62 = vpop.f32.mrb[9].mxu1 }
 0x3ac   :  { %1160 = vrot.lane.b32.xlu1 %v1149_v61, %s4201_s19  ;;  %v1152_v2 = vadd.f32 %v1149_v61, %v750_v1  ;;  %v3337_v61 = vld [vmem:[%s5061_s4 + $0x70] ss:$0 sm:$0xff] }
 0x3ae   :  { %v3322_v3 = vmul.f32 -1.442695, %v1152_v2 }
 0x3b0   :  { %4095 = vpow2.f32 %v3322_v3 }
 0x3ba   :  { %v4096_v4 = vpop.eup %4095 }
 0x3bb   :  { %v1156_v5 = vadd.f32 1.0, %v4096_v4 }
 0x3bd   :  { %4097 = vrcp.f32 %v1156_v5 }
 0x3c7   :  { %v4098_v7 = vpop.eup %4097 }
 0x3c8   :  { %v1170_v18 = vsub.f32 1.0, %v4098_v7  ;;  %v1176_v21 = vmul.f32 %v4098_v7, %v886_v44  ;;  %v3865_v44 = vpack.c.bf16 %v3326_v43, %v3325_v42 }
 0x41e   :  { %v1161_v8 = vpop.permute.xlu1 %1160 }
 0x41f   :  { %v1163_v10 = vmul.f32 %v4098_v7, %v1161_v8 }
 0x421   :  { %1165 = vrot.lane.b32.xlu0 %v1163_v10, %s4201_s19 }
 0x425   :  { %1179 = vrot.lane.b32.xlu0 %v766_v12, %s4203_s25 }
 0x429   :  { %4015 = vrot.lane.b32.xlu0 %v4014_v13, %s4202_s21  ;;  %v759_v13 = vld [vmem:[%s5059_s2 + $0x10] sm:$0xff] }
 0x493   :  { %v1166_v39 = vpop.permute.xlu0 %1165 }
 0x494   :  { %v1168_v14 = vadd.f32 %v1166_v39, %v750_v1  ;;  %v719_v1 = vsub.s32 2, %v4354_v47  ;;  %v767_v39 = vmul.f32 1.0025032, %v759_v13 }
 0x496   :  { %4099 = vtanh.f32 %v1168_v14  ;;  %v720_v2 = vrot.slane %v4362_v50, %v719_v1  ;;  %v4024_v14 = vpack.i.bf16 %v3326_v43, %v3325_v42  ;;  %v3342_v43 = vld [vmem:[%s5062_s5 + $0x60] sm:$0xff] }
 0x497   :  { %v1180_v17 = vpop.permute.xlu0 %1179 }
 0x498   :  { %v751_v3 = vadd.f32 %v720_v2, %v4456_v25 }
 0x49b   :  { %v4016_v22 = vpop.permute.xlu0 %4015 }
 0x49c   :  { %v4018_v26 = vunpack.i.h.bf16 %v4016_v22  ;;  %v4017_v32 = vunpack.i.l.bf16 %v4016_v22 }
 0x49e   :  { %v3853_v33 = vpack.c.bf16 %v4018_v26, %v4017_v32 }
 0x4a0   :  { %v4100_v15 = vpop.eup %4099 }
 0x4a1   :  { %1172 = vrot.lane.b32.xlu1 %v4100_v15, %s4202_s21 }
 0x4a5   :  { %4010 = vrot.lane.b32.xlu1 %v4009_v16, %s4202_s21 }
 0x513   :  { %v1173_v19 = vpop.permute.xlu1 %1172 }
 0x514   :  { %v1175_v20 = vmul.f32 %v1173_v19, %v1170_v18 }
 0x516   :  { %v1177_v23 = vadd.f32 %v1176_v21, %v1175_v20 }
 0x517   :  { %v4011_v24 = vpop.permute.xlu1 %4010 }
 0x518   :  { %v4013_v27 = vunpack.i.h.bf16 %v4011_v24  ;;  %v4012_v28 = vunpack.i.l.bf16 %v4011_v24  ;;  %v4501_v31 = vadd.f32 %v1180_v17, %v1177_v23  ;;  %v4019_v17 = vpack.i.bf16 %v3324_v36, %v4512_v35  ;;  %v4583_v36 = vld [vmem:[%s5062_s5 + $0x50] sm:$0xff] }
 0x51a   :  { %v3850_v9 = vpack.c.bf16 %v4013_v27, %v4012_v28  ;;  %1194 = vrot.lane.b32.xlu1 %v4501_v31, %s4202_s21 }
 0x51c   :  { %3851 = vmatpush3.bf16.msra.mxu0 %v3850_v9 }
 0x51d   :  { %3852 = vmatprep.subr.bf16.mxu0 %v4199_v30 }
 0x520   :  { %3854 = vmatpush3.bf16.msra.mxu0 %v3853_v33  ;;  %v4574_v33 = vld [vmem:[%s5062_s5 + $0x48] ss:$0 sm:$0xff] }
 0x521   :  { %3861 = vmatprep.subr.bf16.mxu0 %v4199_v30 }
 0x523   :  { %3593 = vmatmul.mubr.msk.f32.vlgmr.msra.gmra.mrb[6].mxu0 %vm782_vm4, %v971_v38 }
 0x524   :  { %3863 = vmatpush3.bf16.msra.mxu0 %v3862_v37  ;;  %3614 = vmatprep.mubr.msk.f32.mxu0 %vm4200_vm3, %v4198_v6  ;;  %v3341_v37 = vld [vmem:[%s5062_s5 + $0x58] sm:$0xff] }
 0x525   :  { %3864 = vmatprep.subr.bf16.mxu0 %v4199_v30  ;;  %v3880_v38 = vpack.c.bf16 %v3341_v37, %v4583_v36 }
 0x528   :  { %3866 = vmatpush3.bf16.msra.mxu0 %v3865_v44  ;;  %v3343_v44 = vld [vmem:[%s5062_s5 + $0x68] sm:$0xff] }
 0x529   :  { %3873 = vmatprep.subr.bf16.mxu0 %v4199_v30  ;;  %v3883_v49 = vpack.c.bf16 %v3343_v44, %v3342_v43 }
 0x58c   :  { %v1195_v55 = vpop.permute.xlu1 %1194 }
 0x58d   :  { %3615 = vmatmul.mubr.msk.f32.vlgmr.msra.gmra.mrb[8].mxu0 %vm782_vm4, %v1195_v55 }
 0x58e   :  { %3875 = vmatpush3.bf16.msra.mxu0 %v3874_v52  ;;  %3636 = vmatprep.mubr.msk.f32.mxu0 %vm4200_vm3, %v4198_v6  ;;  %v3350_v52 = vld [vmem:[%s5061_s4 + $0x80] sm:$0xff] }
 0x58f   :  { %3876 = vmatprep.subr.bf16.mxu0 %v4199_v30  ;;  %v3892_v53 = vpack.c.bf16 %v3350_v52, %v3349_v51  ;;  %v3360_v51 = vld [vmem:[%s5062_s5 + $0x90] sm:$0xff] }
 0x592   :  { %3878 = vmatpush3.bf16.msra.mxu0 %v3877_v56 }
 0x593   :  { %3885 = vmatprep.subr.bf16.mxu0 %v4199_v30 }
 0x595   :  { %3637 = vmatmul.mubr.msk.f32.vlgmr.msra.gmra.mrb[10].mxu0 %vm782_vm4, %v1195_v55  ;;  %v3352_v55 = vld [vmem:[%s5061_s4 + $0x90] sm:$0xff] }
 0x596   :  { %3658 = vmatprep.mubr.msk.f32.mxu0 %vm4200_vm3, %v4198_v6 }
 0x5f6   :  { %v4550_v57 = vpop.f32.mrb[6].mxu0 }
 0x5f7   :  { %v3594_v58 = vpop.f32.mrb[7].mxu0 }
 0x5f8   :  { %v3895_v58 = vpack.c.bf16 %v3352_v55, %v3351_v54  ;;  %v3367_v54 = vld [vmem:[%s5061_s4 + $0xa8] sm:$0xff] }
 0x660   :  { %v1264_v59 = vpop.f32.mrb[8].mxu0 }
 0x661   :  { %v3616_v60 = vpop.f32.mrb[9].mxu0 }
 0x668   :  { %v1450_v62 = vpop.f32.mrb[10].mxu0 }
 0x669   :  { %v1451_v63 = vadd.f32 %v3337_v61, %v1450_v62  ;;  %v3638_v0 = vpop.f32.mrb[11].mxu0 }
 0x66b   :  { %1462 = vrot.lane.b32.xlu0 %v1451_v63, %s4201_s19  ;;  %v1454_v4 = vadd.f32 %v1451_v63, %v751_v3  ;;  %v3354_v63 = vld [vmem:[%s5061_s4 + $0x98] ss:$0 sm:$0xff] }
 0x66d   :  { %v3339_v5 = vmul.f32 -1.442695, %v1454_v4 }
 0x66f   :  { %4101 = vpow2.f32 %v3339_v5 }
 0x679   :  { %v4102_v7 = vpop.eup %4101 }
 0x67a   :  { %v1458_v8 = vadd.f32 1.0, %v4102_v7 }
 0x67c   :  { %4103 = vrcp.f32 %v1458_v8 }
 0x686   :  { %v4104_v10 = vpop.eup %4103 }
 0x687   :  { %v1472_v19 = vsub.f32 1.0, %v4104_v10  ;;  %v1478_v22 = vmul.f32 %v4104_v10, %v4501_v31  ;;  %v1265_v31 = vadd.f32 %v4574_v33, %v1264_v59 }
 0x689   :  { %v1268_v42 = vmax.f32 %v1265_v31, 0.0  ;;  %v4645_v31 = vld [vmem:[%s5062_s5 + $0x70] ss:$0 sm:$0xff] }
 0x6dd   :  { %v1463_v11 = vpop.permute.xlu0 %1462 }
 0x6de   :  { %v1465_v12 = vmul.f32 %v4104_v10, %v1463_v11 }
 0x6e0   :  { %1467 = vrot.lane.b32.xlu1 %v1465_v12, %s4201_s19 }
 0x6e4   :  { %1481 = vrot.lane.b32.xlu1 %v767_v39, %s4203_s25 }
 0x6e8   :  { %4025 = vrot.lane.b32.xlu1 %v4024_v14, %s4202_s21  ;;  %v760_v14 = vld [vmem:[%s5059_s2 + $0x18] sm:$0xff] }
 0x752   :  { %v1468_v25 = vpop.permute.xlu1 %1467 }
 0x753   :  { %v1470_v15 = vadd.f32 %v1468_v25, %v751_v3  ;;  %v723_v3 = vsub.s32 3, %v4354_v47  ;;  %v768_v25 = vmul.f32 1.0025032, %v760_v14 }
 0x755   :  { %4105 = vtanh.f32 %v1470_v15  ;;  %v724_v4 = vrot.slane %v4362_v50, %v723_v3  ;;  %v4034_v15 = vpack.i.bf16 %v3343_v44, %v3342_v43 }
 0x756   :  { %v1482_v18 = vpop.permute.xlu1 %1481 }
 0x757   :  { %v752_v5 = vadd.f32 %v724_v4, %v4458_v45 }
 0x75a   :  { %v4026_v23 = vpop.permute.xlu1 %4025 }
 0x75b   :  { %v4028_v27 = vunpack.i.h.bf16 %v4026_v23  ;;  %v4027_v9 = vunpack.i.l.bf16 %v4026_v23 }
 0x75d   :  { %v3871_v35 = vpack.c.bf16 %v4028_v27, %v4027_v9 }
 0x75f   :  { %v4106_v16 = vpop.eup %4105 }
 0x760   :  { %1474 = vrot.lane.b32.xlu0 %v4106_v16, %s4202_s21 }
 0x764   :  { %4020 = vrot.lane.b32.xlu0 %v4019_v17, %s4202_s21 }
 0x7d2   :  { %v1475_v20 = vpop.permute.xlu0 %1474 }
 0x7d3   :  { %v1477_v21 = vmul.f32 %v1475_v20, %v1472_v19 }
 0x7d5   :  { %v1479_v24 = vadd.f32 %v1478_v22, %v1477_v21 }
 0x7d6   :  { %v4021_v26 = vpop.permute.xlu0 %4020 }
 0x7d7   :  { %v4023_v28 = vunpack.i.h.bf16 %v4021_v26  ;;  %v4022_v32 = vunpack.i.l.bf16 %v4021_v26  ;;  %v4569_v29 = vadd.f32 %v1482_v18, %v1479_v24  ;;  %v4029_v18 = vpack.i.bf16 %v3341_v37, %v4583_v36 }
 0x7d9   :  { %v3868_v34 = vpack.c.bf16 %v4023_v28, %v4022_v32  ;;  %1496 = vrot.lane.b32.xlu0 %v4569_v29, %s4202_s21 }
 0x7db   :  { %3869 = vmatpush3.bf16.msra.mxu1 %v3868_v34 }
 0x7dc   :  { %3870 = vmatprep.subr.bf16.mxu1 %v4199_v30 }
 0x7df   :  { %3872 = vmatpush3.bf16.msra.mxu1 %v3871_v35 }
 0x7e0   :  { %3879 = vmatprep.subr.bf16.mxu1 %v4199_v30 }
 0x7e2   :  { %3626 = vmatmul.mubr.msk.f32.vlgmr.msra.gmra.mrb[10].mxu1 %vm782_vm4, %v1268_v42  ;;  %v3358_v42 = vld [vmem:[%s5062_s5 + $0x80] sm:$0xff] }
 0x7e3   :  { %3881 = vmatpush3.bf16.msra.mxu1 %v3880_v38  ;;  %3647 = vmatprep.mubr.msk.f32.mxu1 %vm4200_vm3, %v4198_v6  ;;  %v4654_v38 = vld [vmem:[%s5062_s5 + $0x78] sm:$0xff] }
 0x7e4   :  { %3882 = vmatprep.subr.bf16.mxu1 %v4199_v30  ;;  %v3898_v43 = vpack.c.bf16 %v3358_v42, %v4654_v38 }
 0x7e7   :  { %3884 = vmatpush3.bf16.msra.mxu1 %v3883_v49  ;;  %v3359_v49 = vld [vmem:[%s5062_s5 + $0x88] sm:$0xff] }
 0x7e8   :  { %3891 = vmatprep.subr.bf16.mxu1 %v4199_v30  ;;  %v3901_v52 = vpack.c.bf16 %v3360_v51, %v3359_v49 }
 0x84b   :  { %v1497_v56 = vpop.permute.xlu0 %1496 }
 0x84c   :  { %3648 = vmatmul.mubr.msk.f32.vlgmr.msra.gmra.mrb[12].mxu1 %vm782_vm4, %v1497_v56 }
 0x84d   :  { %3893 = vmatpush3.bf16.msra.mxu1 %v3892_v53  ;;  %3669 = vmatprep.mubr.msk.f32.mxu1 %vm4200_vm3, %v4198_v6  ;;  %v3366_v53 = vld [vmem:[%s5061_s4 + $0xa0] sm:$0xff] }
 0x84e   :  { %3894 = vmatprep.subr.bf16.mxu1 %v4199_v30  ;;  %v3910_v55 = vpack.c.bf16 %v3367_v54, %v3366_v53  ;;  %v3376_v53 = vld [vmem:[%s5062_s5 + $0xb0] sm:$0xff]  ;;  %v3377_v54 = vld [vmem:[%s5062_s5 + $0xb8] sm:$0xff] }
 0x851   :  { %3896 = vmatpush3.bf16.msra.mxu1 %v3895_v58  ;;  %v3369_v58 = vld [vmem:[%s5061_s4 + $0xb8] sm:$0xff] }
 0x852   :  { %3903 = vmatprep.subr.bf16.mxu1 %v4199_v30 }
 0x854   :  { %3670 = vmatmul.mubr.msk.f32.vlgmr.msra.gmra.mrb[14].mxu1 %vm782_vm4, %v1497_v56  ;;  %v3368_v56 = vld [vmem:[%s5061_s4 + $0xb0] sm:$0xff] }
 0x855   :  { %3691 = vmatprep.mubr.msk.f32.mxu1 %vm4200_vm3, %v4198_v6 }
 0x8b5   :  { %v4621_v59 = vpop.f32.mrb[10].mxu1 }
 0x8b6   :  { %v3627_v60 = vpop.f32.mrb[11].mxu1 }
 0x91f   :  { %v1566_v61 = vpop.f32.mrb[12].mxu1 }
 0x920   :  { %v3649_v62 = vpop.f32.mrb[13].mxu1 }
 0x927   :  { %v1752_v0 = vpop.f32.mrb[14].mxu1 }
 0x928   :  { %v1753_v1 = vadd.f32 %v3354_v63, %v1752_v0  ;;  %v3671_v2 = vpop.f32.mrb[15].mxu1 }
 0x929   :  { %v3371_v2 = vld [vmem:[%s5061_s4 + $0xc0] ss:$0 sm:$0xff] }
 0x92a   :  { %1764 = vrot.lane.b32.xlu1 %v1753_v1, %s4201_s19  ;;  %v1756_v7 = vadd.f32 %v1753_v1, %v752_v5 }
 0x92c   :  { %v3356_v8 = vmul.f32 -1.442695, %v1756_v7  ;;  %v727_v7 = vsub.s32 4, %v4354_v47 }
 0x92e   :  { %4107 = vpow2.f32 %v3356_v8  ;;  %v728_v8 = vrot.slane %v4362_v50, %v727_v7  ;;  %v3388_v7 = vld [vmem:[%s5061_s4 + $0xe8] ss:$0 sm:$0xff] }
 0x938   :  { %v4108_v10 = vpop.eup %4107 }
 0x939   :  { %v1760_v11 = vadd.f32 1.0, %v4108_v10  ;;  %v753_v10 = vadd.f32 %v728_v8, %v4346_v40 }
 0x93b   :  { %4109 = vrcp.f32 %v1760_v11 }
 0x945   :  { %v4110_v12 = vpop.eup %4109 }
 0x946   :  { %v1774_v20 = vsub.f32 1.0, %v4110_v12  ;;  %v1780_v23 = vmul.f32 %v4110_v12, %v4569_v29  ;;  %v1567_v29 = vadd.f32 %v4645_v31, %v1566_v61  ;;  %v3913_v61 = vpack.c.bf16 %v3369_v58, %v3368_v56  ;;  %v3383_v56 = vld [vmem:[%s5061_s4 + $0xc8] sm:$0xff]  ;;  %v3384_v58 = vld [vmem:[%s5061_s4 + $0xd0] sm:$0xff] }
 0x948   :  { %v1570_v44 = vmax.f32 %v1567_v29, 0.0 }
 0x99c   :  { %v1765_v13 = vpop.permute.xlu1 %1764 }
 0x99d   :  { %v1767_v39 = vmul.f32 %v4110_v12, %v1765_v13 }
 0x99f   :  { %1769 = vrot.lane.b32.xlu0 %v1767_v39, %s4201_s19 }
 0x9a3   :  { %1783 = vrot.lane.b32.xlu0 %v768_v25, %s4203_s25 }
 0x9a7   :  { %4035 = vrot.lane.b32.xlu0 %v4034_v15, %s4202_s21 }
 0xa11   :  { %v1770_v45 = vpop.permute.xlu0 %1769 }
 0xa12   :  { %v1772_v16 = vadd.f32 %v1770_v45, %v752_v5  ;;  %v761_v45 = vld [vmem:[%s5059_s2 + $0x20] sm:$0xff] }
 0xa14   :  { %4111 = vtanh.f32 %v1772_v16  ;;  %v769_v16 = vmul.f32 1.0025032, %v761_v45 }
 0xa15   :  { %v1784_v19 = vpop.permute.xlu0 %1783 }
 0xa19   :  { %v4036_v24 = vpop.permute.xlu0 %4035 }
 0xa1a   :  { %v4038_v28 = vunpack.i.h.bf16 %v4036_v24  ;;  %v4037_v35 = vunpack.i.l.bf16 %v4036_v24 }
 0xa1c   :  { %v3889_v37 = vpack.c.bf16 %v4038_v28, %v4037_v35 }
 0xa1e   :  { %v4112_v17 = vpop.eup %4111 }
 0xa1f   :  { %1776 = vrot.lane.b32.xlu1 %v4112_v17, %s4202_s21  ;;  %v4044_v17 = vpack.i.bf16 %v3360_v51, %v3359_v49  ;;  %v3375_v49 = vld [vmem:[%s5062_s5 + $0xa8] sm:$0xff] }
 0xa23   :  { %4030 = vrot.lane.b32.xlu1 %v4029_v18, %s4202_s21 }
 0xa91   :  { %v1777_v21 = vpop.permute.xlu1 %1776 }
 0xa92   :  { %v1779_v22 = vmul.f32 %v1777_v21, %v1774_v20  ;;  %v4039_v20 = vpack.i.bf16 %v3358_v42, %v4654_v38  ;;  %v4716_v38 = vld [vmem:[%s5062_s5 + $0x98] ss:$0 sm:$0xff] }
 0xa94   :  { %v1781_v26 = vadd.f32 %v1780_v23, %v1779_v22 }
 0xa95   :  { %v4031_v27 = vpop.permute.xlu1 %4030 }
 0xa96   :  { %v4033_v32 = vunpack.i.h.bf16 %v4031_v27  ;;  %v4032_v9 = vunpack.i.l.bf16 %v4031_v27  ;;  %v4640_v34 = vadd.f32 %v1784_v19, %v1781_v26 }
 0xa98   :  { %v3886_v36 = vpack.c.bf16 %v4033_v32, %v4032_v9  ;;  %1798 = vrot.lane.b32.xlu1 %v4640_v34, %s4202_s21 }
 0xa9a   :  { %3887 = vmatpush3.bf16.msra.mxu0 %v3886_v36 }
 0xa9b   :  { %3888 = vmatprep.subr.bf16.mxu0 %v4199_v30 }
 0xa9e   :  { %3890 = vmatpush3.bf16.msra.mxu0 %v3889_v37 }
 0xa9f   :  { %3897 = vmatprep.subr.bf16.mxu0 %v4199_v30 }
 0xaa1   :  { %3659 = vmatmul.mubr.msk.f32.vlgmr.msra.gmra.mrb[12].mxu0 %vm782_vm4, %v1570_v44  ;;  %v4725_v44 = vld [vmem:[%s5062_s5 + $0xa0] sm:$0xff] }
 0xaa2   :  { %3899 = vmatpush3.bf16.msra.mxu0 %v3898_v43  ;;  %3680 = vmatprep.mubr.msk.f32.mxu0 %vm4200_vm3, %v4198_v6  ;;  %v3916_v51 = vpack.c.bf16 %v3375_v49, %v4725_v44 }
 0xaa3   :  { %3900 = vmatprep.subr.bf16.mxu0 %v4199_v30 }
 0xaa6   :  { %3902 = vmatpush3.bf16.msra.mxu0 %v3901_v52 }
 0xaa7   :  { %3909 = vmatprep.subr.bf16.mxu0 %v4199_v30 }
 0xb0a   :  { %v1799_v60 = vpop.permute.xlu1 %1798 }
 0xb0b   :  { %3681 = vmatmul.mubr.msk.f32.vlgmr.msra.gmra.mrb[14].mxu0 %vm782_vm4, %v1799_v60 }
 0xb0c   :  { %3911 = vmatpush3.bf16.msra.mxu0 %v3910_v55  ;;  %3702 = vmatprep.mubr.msk.f32.mxu0 %vm4200_vm3, %v4198_v6  ;;  %v3919_v55 = vpack.c.bf16 %v3377_v54, %v3376_v53 }
 0xb0d   :  { %3912 = vmatprep.subr.bf16.mxu0 %v4199_v30 }
 0xb10   :  { %3914 = vmatpush3.bf16.msra.mxu0 %v3913_v61  ;;  %v3385_v61 = vld [vmem:[%s5061_s4 + $0xd8] sm:$0xff] }
 0xb11   :  { %3921 = vmatprep.subr.bf16.mxu0 %v4199_v30 }
 0xb13   :  { %3703 = vmatmul.mubr.msk.f32.vlgmr.msra.gmra.mrb[16].mxu0 %vm782_vm4, %v1799_v60  ;;  %v3928_v60 = vpack.c.bf16 %v3384_v58, %v3383_v56  ;;  %v3393_v58 = vld [vmem:[%s5062_s5 + $0xd8] sm:$0xff] }
 0xb14   :  { %3724 = vmatprep.mubr.msk.f32.mxu0 %vm4200_vm3, %v4198_v6 }
 0xb74   :  { %v4692_v62 = vpop.f32.mrb[12].mxu0 }
 0xb75   :  { %v3660_v63 = vpop.f32.mrb[13].mxu0 }
 0xb76   :  { %v3386_v63 = vld [vmem:[%s5061_s4 + $0xe0] sm:$0xff] }
 0xbde   :  { %v1868_v0 = vpop.f32.mrb[14].mxu0 }
 0xbdf   :  { %v3682_v1 = vpop.f32.mrb[15].mxu0 }
 0xbe0   :  { %v3931_v1 = vpack.c.bf16 %v3386_v63, %v3385_v61  ;;  %v3400_v63 = vld [vmem:[%s5061_s4 + $0xf0] sm:$0xff] }
 0xbe6   :  { %v2054_v3 = vpop.f32.mrb[16].mxu0 }
 0xbe7   :  { %v2055_v4 = vadd.f32 %v3371_v2, %v2054_v3  ;;  %v3704_v5 = vpop.f32.mrb[17].mxu0 }
 0xbe9   :  { %2066 = vrot.lane.b32.xlu0 %v2055_v4, %s4201_s19  ;;  %v2058_v11 = vadd.f32 %v2055_v4, %v753_v10 }
 0xbeb   :  { %v3373_v12 = vmul.f32 -1.442695, %v2058_v11 }
 0xbed   :  { %4113 = vpow2.f32 %v3373_v12  ;;  %v731_v12 = vsub.s32 5, %v4354_v47 }
 0xbf7   :  { %v4114_v13 = vpop.eup %4113 }
 0xbf8   :  { %v2062_v39 = vadd.f32 1.0, %v4114_v13  ;;  %v732_v13 = vrot.slane %v4362_v50, %v731_v12 }
 0xbfa   :  { %4115 = vrcp.f32 %v2062_v39  ;;  %v754_v39 = vadd.f32 %v732_v13, %v4348_v41  ;;  %v3405_v13 = vld [vmem:[%s5061_s4 + $0x110] ss:$0 sm:$0xff] }
 0xc04   :  { %v4116_v14 = vpop.eup %4115 }
 0xc05   :  { %v2076_v22 = vsub.f32 1.0, %v4116_v14  ;;  %v2082_v26 = vmul.f32 %v4116_v14, %v4640_v34  ;;  %v1869_v34 = vadd.f32 %v4716_v38, %v1868_v0 }
 0xc07   :  { %v1872_v52 = vmax.f32 %v1869_v34, 0.0 }
 0xc5b   :  { %v2067_v25 = vpop.permute.xlu0 %2066 }
 0xc5c   :  { %v2069_v15 = vmul.f32 %v4116_v14, %v2067_v25 }
 0xc5e   :  { %2071 = vrot.lane.b32.xlu1 %v2069_v15, %s4201_s19 }
 0xc62   :  { %2085 = vrot.lane.b32.xlu1 %v769_v16, %s4203_s25 }
 0xc66   :  { %4045 = vrot.lane.b32.xlu1 %v4044_v17, %s4202_s21 }
 0xcd0   :  { %v2072_v40 = vpop.permute.xlu1 %2071 }
 0xcd1   :  { %v2074_v18 = vadd.f32 %v2072_v40, %v753_v10 }
 0xcd3   :  { %4117 = vtanh.f32 %v2074_v18  ;;  %v762_v18 = vld [vmem:[%s5059_s2 + $0x28] sm:$0xff] }
 0xcd4   :  { %v2086_v21 = vpop.permute.xlu1 %2085 }
 0xcd8   :  { %v4046_v27 = vpop.permute.xlu1 %4045 }
 0xcd9   :  { %v4048_v9 = vunpack.i.h.bf16 %v4046_v27  ;;  %v4047_v29 = vunpack.i.l.bf16 %v4046_v27 }
 0xcdb   :  { %v3907_v43 = vpack.c.bf16 %v4048_v9, %v4047_v29 }
 0xcdd   :  { %v4118_v19 = vpop.eup %4117 }
 0xcde   :  { %2078 = vrot.lane.b32.xlu0 %v4118_v19, %s4202_s21  ;;  %v770_v19 = vmul.f32 1.0025032, %v762_v18 }
 0xce2   :  { %4040 = vrot.lane.b32.xlu0 %v4039_v20, %s4202_s21  ;;  %v4054_v20 = vpack.i.bf16 %v3377_v54, %v3376_v53  ;;  %v4796_v53 = vld [vmem:[%s5062_s5 + $0xc8] sm:$0xff]  ;;  %v3392_v54 = vld [vmem:[%s5062_s5 + $0xd0] sm:$0xff] }
 0xd50   :  { %v2079_v23 = vpop.permute.xlu0 %2078 }
 0xd51   :  { %v2081_v24 = vmul.f32 %v2079_v23, %v2076_v22  ;;  %v4049_v23 = vpack.i.bf16 %v3375_v49, %v4725_v44  ;;  %v4787_v44 = vld [vmem:[%s5062_s5 + $0xc0] ss:$0 sm:$0xff] }
 0xd53   :  { %v2083_v28 = vadd.f32 %v2082_v26, %v2081_v24 }
 0xd54   :  { %v4041_v32 = vpop.permute.xlu0 %4040 }
 0xd55   :  { %v4043_v35 = vunpack.i.h.bf16 %v4041_v32  ;;  %v4042_v36 = vunpack.i.l.bf16 %v4041_v32  ;;  %v4711_v37 = vadd.f32 %v2086_v21, %v2083_v28 }
 0xd57   :  { %v3904_v42 = vpack.c.bf16 %v4043_v35, %v4042_v36  ;;  %2100 = vrot.lane.b32.xlu0 %v4711_v37, %s4202_s21 }
 0xd59   :  { %3905 = vmatpush3.bf16.msra.mxu1 %v3904_v42 }
 0xd5a   :  { %3906 = vmatprep.subr.bf16.mxu1 %v4199_v30 }
 0xd5d   :  { %3908 = vmatpush3.bf16.msra.mxu1 %v3907_v43 }
 0xd5e   :  { %3915 = vmatprep.subr.bf16.mxu1 %v4199_v30 }
 0xd60   :  { %3692 = vmatmul.mubr.msk.f32.vlgmr.msra.gmra.mrb[16].mxu1 %vm782_vm4, %v1872_v52 }
 0xd61   :  { %3917 = vmatpush3.bf16.msra.mxu1 %v3916_v51  ;;  %3713 = vmatprep.mubr.msk.f32.mxu1 %vm4200_vm3, %v4198_v6 }
 0xd62   :  { %3918 = vmatprep.subr.bf16.mxu1 %v4199_v30 }
 0xd65   :  { %3920 = vmatpush3.bf16.msra.mxu1 %v3919_v55  ;;  %v3934_v55 = vpack.c.bf16 %v3392_v54, %v4796_v53 }
 0xd66   :  { %3927 = vmatprep.subr.bf16.mxu1 %v4199_v30 }
 0xdc9   :  { %v2101_v0 = vpop.permute.xlu0 %2100 }
 0xdca   :  { %3714 = vmatmul.mubr.msk.f32.vlgmr.msra.gmra.mrb[18].mxu1 %vm782_vm4, %v2101_v0 }
 0xdcb   :  { %3929 = vmatpush3.bf16.msra.mxu1 %v3928_v60  ;;  %3735 = vmatprep.mubr.msk.f32.mxu1 %vm4200_vm3, %v4198_v6  ;;  %v3394_v60 = vld [vmem:[%s5062_s5 + $0xe0] sm:$0xff] }
 0xdcc   :  { %3930 = vmatprep.subr.bf16.mxu1 %v4199_v30  ;;  %v3937_v61 = vpack.c.bf16 %v3394_v60, %v3393_v58 }
 0xdcf   :  { %3932 = vmatpush3.bf16.msra.mxu1 %v3931_v1 }
 0xdd0   :  { %3939 = vmatprep.subr.bf16.mxu1 %v4199_v30 }
 0xdd2   :  { %3736 = vmatmul.mubr.msk.f32.vlgmr.msra.gmra.mrb[20].mxu1 %vm782_vm4, %v2101_v0  ;;  %v3401_v0 = vld [vmem:[%s5061_s4 + $0xf8] sm:$0xff] }
 0xdd3   :  { %3757 = vmatprep.mubr.msk.f32.mxu1 %vm4200_vm3, %v4198_v6  ;;  %v3946_v1 = vpack.c.bf16 %v3401_v0, %v3400_v63 }
 0xe33   :  { %v4763_v2 = vpop.f32.mrb[16].mxu1 }
 0xe34   :  { %v3693_v3 = vpop.f32.mrb[17].mxu1 }
 0xe35   :  { %v3402_v3 = vld [vmem:[%s5061_s4 + $0x100] sm:$0xff] }
 0xe9d   :  { %v2170_v4 = vpop.f32.mrb[18].mxu1 }
 0xe9e   :  { %v3715_v5 = vpop.f32.mrb[19].mxu1 }
 0xea5   :  { %v2356_v8 = vpop.f32.mrb[20].mxu1 }
 0xea6   :  { %v2357_v10 = vadd.f32 %v3388_v7, %v2356_v8  ;;  %v3737_v11 = vpop.f32.mrb[21].mxu1 }
 0xea8   :  { %2368 = vrot.lane.b32.xlu1 %v2357_v10, %s4201_s19  ;;  %v2360_v14 = vadd.f32 %v2357_v10, %v754_v39 }
 0xeaa   :  { %v3390_v25 = vmul.f32 -1.442695, %v2360_v14 }
 0xeac   :  { %4119 = vpow2.f32 %v3390_v25 }
 0xeb6   :  { %v4120_v15 = vpop.eup %4119 }
 0xeb7   :  { %v2364_v45 = vadd.f32 1.0, %v4120_v15  ;;  %v735_v15 = vsub.s32 6, %v4354_v47 }
 0xeb9   :  { %4121 = vrcp.f32 %v2364_v45  ;;  %v736_v45 = vrot.slane %v4362_v50, %v735_v15 }
 0xec3   :  { %v4122_v16 = vpop.eup %4121 }
 0xec4   :  { %v2378_v26 = vsub.f32 1.0, %v4122_v16  ;;  %v2384_v32 = vmul.f32 %v4122_v16, %v4711_v37  ;;  %v2171_v37 = vadd.f32 %v4787_v44, %v2170_v4  ;;  %v3403_v4 = vld [vmem:[%s5061_s4 + $0x108] sm:$0xff] }
 0xec5   :  { %v3949_v7 = vpack.c.bf16 %v3403_v4, %v3402_v3  ;;  %v3411_v3 = vld [vmem:[%s5062_s5 + $0x108] sm:$0xff] }
 0xec6   :  { %v2174_v56 = vmax.f32 %v2171_v37, 0.0 }
 0xf1a   :  { %v2369_v17 = vpop.permute.xlu1 %2368 }
 0xf1b   :  { %v2371_v40 = vmul.f32 %v4122_v16, %v2369_v17  ;;  %v755_v16 = vadd.f32 %v736_v45, %v4460_v46 }
 0xf1d   :  { %2373 = vrot.lane.b32.xlu0 %v2371_v40, %s4201_s19 }
 0xf21   :  { %2387 = vrot.lane.b32.xlu0 %v770_v19, %s4203_s25 }
 0xf25   :  { %4055 = vrot.lane.b32.xlu0 %v4054_v20, %s4202_s21 }
 0xf8f   :  { %v2374_v41 = vpop.permute.xlu0 %2373 }
 0xf90   :  { %v2376_v21 = vadd.f32 %v2374_v41, %v754_v39 }
 0xf92   :  { %4123 = vtanh.f32 %v2376_v21 }
 0xf93   :  { %v2388_v24 = vpop.permute.xlu0 %2387 }
 0xf97   :  { %v4056_v9 = vpop.permute.xlu0 %4055 }
 0xf98   :  { %v4058_v29 = vunpack.i.h.bf16 %v4056_v9  ;;  %v4057_v51 = vunpack.i.l.bf16 %v4056_v9 }
 0xf9a   :  { %v3925_v52 = vpack.c.bf16 %v4058_v29, %v4057_v51 }
 0xf9c   :  { %v4124_v22 = vpop.eup %4123 }
 0xf9d   :  { %2380 = vrot.lane.b32.xlu1 %v4124_v22, %s4202_s21  ;;  %v763_v22 = vld [vmem:[%s5059_s2 + $0x30] sm:$0xff] }
 0xfa1   :  { %4050 = vrot.lane.b32.xlu1 %v4049_v23, %s4202_s21  ;;  %v771_v23 = vmul.f32 1.0025032, %v763_v22 }
0x100f   :  { %v2381_v27 = vpop.permute.xlu1 %2380 }
0x1010   :  { %v2383_v28 = vmul.f32 %v2381_v27, %v2378_v26 }
0x1012   :  { %v2385_v35 = vadd.f32 %v2384_v32, %v2383_v28  ;;  %v4059_v28 = vpack.i.bf16 %v3392_v54, %v4796_v53  ;;  %v4858_v53 = vld [vmem:[%s5062_s5 + $0xe8] ss:$0 sm:$0xff] }
0x1013   :  { %v4051_v36 = vpop.permute.xlu1 %4050 }
0x1014   :  { %v4053_v42 = vunpack.i.h.bf16 %v4051_v36  ;;  %v4052_v43 = vunpack.i.l.bf16 %v4051_v36  ;;  %v4782_v34 = vadd.f32 %v2388_v24, %v2385_v35  ;;  %v4064_v24 = vpack.i.bf16 %v3394_v60, %v3393_v58  ;;  %v4867_v60 = vld [vmem:[%s5062_s5 + $0xf0] sm:$0xff] }
0x1016   :  { %v3922_v49 = vpack.c.bf16 %v4053_v42, %v4052_v43  ;;  %2402 = vrot.lane.b32.xlu1 %v4782_v34, %s4202_s21 }
0x1018   :  { %3923 = vmatpush3.bf16.msra.mxu0 %v3922_v49 }
0x1019   :  { %3924 = vmatprep.subr.bf16.mxu0 %v4199_v30 }
0x101c   :  { %3926 = vmatpush3.bf16.msra.mxu0 %v3925_v52 }
0x101d   :  { %3933 = vmatprep.subr.bf16.mxu0 %v4199_v30 }
0x101f   :  { %3725 = vmatmul.mubr.msk.f32.vlgmr.msra.gmra.mrb[18].mxu0 %vm782_vm4, %v2174_v56 }
0x1020   :  { %3935 = vmatpush3.bf16.msra.mxu0 %v3934_v55  ;;  %3746 = vmatprep.mubr.msk.f32.mxu0 %vm4200_vm3, %v4198_v6 }
0x1021   :  { %3936 = vmatprep.subr.bf16.mxu0 %v4199_v30 }
0x1024   :  { %3938 = vmatpush3.bf16.msra.mxu0 %v3937_v61  ;;  %v4872_v61 = vld [vmem:[%s5062_s5 + $0xf8] sm:$0xff] }
0x1025   :  { %3945 = vmatprep.subr.bf16.mxu0 %v4199_v30  ;;  %v3952_v63 = vpack.c.bf16 %v4872_v61, %v4867_v60 }
0x1088   :  { %v2403_v5 = vpop.permute.xlu1 %2402 }
0x1089   :  { %3747 = vmatmul.mubr.msk.f32.vlgmr.msra.gmra.mrb[20].mxu0 %vm782_vm4, %v2403_v5 }
0x108a   :  { %3947 = vmatpush3.bf16.msra.mxu0 %v3946_v1  ;;  %3768 = vmatprep.mubr.msk.f32.mxu0 %vm4200_vm3, %v4198_v6  ;;  %v3410_v1 = vld [vmem:[%s5062_s5 + $0x100] sm:$0xff] }
0x108b   :  { %3948 = vmatprep.subr.bf16.mxu0 %v4199_v30  ;;  %v3955_v4 = vpack.c.bf16 %v3411_v3, %v3410_v1 }
0x108e   :  { %3950 = vmatpush3.bf16.msra.mxu0 %v3949_v7  ;;  %v3418_v7 = vld [vmem:[%s5061_s4 + $0x120] sm:$0xff] }
0x108f   :  { %3957 = vmatprep.subr.bf16.mxu0 %v4199_v30 }
0x1091   :  { %3769 = vmatmul.mubr.msk.f32.vlgmr.msra.gmra.mrb[22].mxu0 %vm782_vm4, %v2403_v5  ;;  %v3417_v5 = vld [vmem:[%s5061_s4 + $0x118] sm:$0xff] }
0x1092   :  { %3790 = vmatprep.mubr.msk.f32.mxu0 %vm4200_vm3, %v4198_v6 }
0x10f2   :  { %v4834_v8 = vpop.f32.mrb[18].mxu0 }
0x10f3   :  { %v3726_v10 = vpop.f32.mrb[19].mxu0 }
0x10f4   :  { %v3964_v10 = vpack.c.bf16 %v3418_v7, %v3417_v5 }
0x115c   :  { %v2472_v11 = vpop.f32.mrb[20].mxu0 }
0x115d   :  { %v3748_v12 = vpop.f32.mrb[21].mxu0 }
0x115e   :  { %v3420_v12 = vld [vmem:[%s5061_s4 + $0x130] sm:$0xff] }
0x1164   :  { %v2658_v39 = vpop.f32.mrb[22].mxu0 }
0x1165   :  { %v2659_v14 = vadd.f32 %v3405_v13, %v2658_v39  ;;  %v3770_v25 = vpop.f32.mrb[23].mxu0 }
0x1167   :  { %2670 = vrot.lane.b32.xlu0 %v2659_v14, %s4201_s19  ;;  %v2662_v17 = vadd.f32 %v2659_v14, %v755_v16 }
0x1169   :  { %v3407_v40 = vmul.f32 -1.442695, %v2662_v17 }
0x116b   :  { %4125 = vpow2.f32 %v3407_v40  ;;  %v4916_v40 = vld [vmem:[%s5062_s5 + $0x118] sm:$0xff] }
0x1175   :  { %v4126_v18 = vpop.eup %4125 }
0x1176   :  { %v2666_v19 = vadd.f32 1.0, %v4126_v18  ;;  %v4921_v18 = vld [vmem:[%s5062_s5 + $0x120] sm:$0xff] }
0x1178   :  { %4127 = vrcp.f32 %v2666_v19 }
0x1182   :  { %v4128_v20 = vpop.eup %4127 }
0x1183   :  { %v2680_v9 = vsub.f32 1.0, %v4128_v20  ;;  %v2686_v29 = vmul.f32 %v4128_v20, %v4782_v34  ;;  %v2473_v34 = vadd.f32 %v4858_v53, %v2472_v11  ;;  %v3419_v11 = vld [vmem:[%s5061_s4 + $0x128] sm:$0xff] }
0x1184   :  { %v3967_v39 = vpack.c.bf16 %v3420_v12, %v3419_v11 }
0x1185   :  { %v2476_v0 = vmax.f32 %v2473_v34, 0.0 }
0x11d9   :  { %v2671_v41 = vpop.permute.xlu0 %2670 }
0x11da   :  { %v2673_v21 = vmul.f32 %v4128_v20, %v2671_v41  ;;  %v3970_v41 = vpack.c.bf16 %v4921_v18, %v4916_v40 }
0x11dc   :  { %2675 = vrot.lane.b32.xlu1 %v2673_v21, %s4201_s19  ;;  %v739_v21 = vsub.s32 7, %v4354_v47 }
0x11de   :  { %v740_v22 = vrot.slane %v4362_v50, %v739_v21  ;;  %v4074_v50 = vpack.i.bf16 %v3411_v3, %v3410_v1 }
0x11e0   :  { %2689 = vrot.lane.b32.xlu1 %v771_v23, %s4203_s25  ;;  %v756_v23 = vadd.f32 %v740_v22, %v4462_v48  ;;  %v4079_v48 = vpack.i.bf16 %v4921_v18, %v4916_v40  ;;  %v3187_v40 = vld [vmem:[%s5063_s6 + $0x8] sm:$0xff]  ;;  %v3188_v18 = vld [vmem:[%s5063_s6 + $0x10] sm:$0xff] }
0x11e4   :  { %4065 = vrot.lane.b32.xlu1 %v4064_v24, %s4202_s21 }
0x124e   :  { %v2676_v46 = vpop.permute.xlu1 %2675 }
0x124f   :  { %v2678_v26 = vadd.f32 %v2676_v46, %v755_v16  ;;  %v3422_v16 = vld [vmem:[%s5061_s4 + $0x138] ss:$0 sm:$0xff] }
0x1251   :  { %4129 = vtanh.f32 %v2678_v26 }
0x1252   :  { %v2690_v32 = vpop.permute.xlu1 %2689 }
0x1256   :  { %v4066_v42 = vpop.permute.xlu1 %4065 }
0x1257   :  { %v4068_v49 = vunpack.i.h.bf16 %v4066_v42  ;;  %v4067_v56 = vunpack.i.l.bf16 %v4066_v42 }
0x1259   :  { %v3943_v58 = vpack.c.bf16 %v4068_v49, %v4067_v56 }
0x125b   :  { %v4130_v27 = vpop.eup %4129 }
0x125c   :  { %2682 = vrot.lane.b32.xlu0 %v4130_v27, %s4202_s21 }
0x1260   :  { %4060 = vrot.lane.b32.xlu0 %v4059_v28, %s4202_s21 }
0x12ce   :  { %v2683_v35 = vpop.permute.xlu0 %2682 }
0x12cf   :  { %v2685_v36 = vmul.f32 %v2683_v35, %v2680_v9  ;;  %v764_v9 = vld [vmem:[%s5059_s2 + $0x38] sm:$0xff] }
0x12d0   :  { %v772_v47 = vmul.f32 1.0025032, %v764_v9 }
0x12d1   :  { %v2687_v43 = vadd.f32 %v2686_v29, %v2685_v36  ;;  %v4950_v36 = vld [vmem:[%s5062_s5 + $0x138] ss:$0 sm:$0xff] }
0x12d2   :  { %v4061_v51 = vpop.permute.xlu0 %4060 }
0x12d3   :  { %v4063_v52 = vunpack.i.h.bf16 %v4061_v51  ;;  %v4062_v37 = vunpack.i.l.bf16 %v4061_v51  ;;  %v4853_v55 = vadd.f32 %v2690_v32, %v2687_v43 }
0x12d5   :  { %v3940_v54 = vpack.c.bf16 %v4063_v52, %v4062_v37  ;;  %2704 = vrot.lane.b32.xlu0 %v4853_v55, %s4202_s21  ;;  %v4069_v37 = vpack.i.bf16 %v4872_v61, %v4867_v60 }
0x12d7   :  { %3941 = vmatpush3.bf16.msra.mxu1 %v3940_v54 }
0x12d8   :  { %3942 = vmatprep.subr.bf16.mxu1 %v4199_v30 }
0x12db   :  { %3944 = vmatpush3.bf16.msra.mxu1 %v3943_v58 }
0x12dc   :  { %3951 = vmatprep.subr.bf16.mxu1 %v4199_v30 }
0x12de   :  { %3758 = vmatmul.mubr.msk.f32.vlgmr.msra.gmra.mrb[22].mxu1 %vm782_vm4, %v2476_v0 }
0x12df   :  { %3953 = vmatpush3.bf16.msra.mxu1 %v3952_v63  ;;  %3779 = vmatprep.mubr.msk.f32.mxu1 %vm4200_vm3, %v4198_v6 }
0x12e0   :  { %3954 = vmatprep.subr.bf16.mxu1 %v4199_v30 }
0x12e3   :  { %3956 = vmatpush3.bf16.msra.mxu1 %v3955_v4 }
0x12e4   :  { %3963 = vmatprep.subr.bf16.mxu1 %v4199_v30 }
0x1347   :  { %v2705_v13 = vpop.permute.xlu0 %2704 }
0x1348   :  { %3780 = vmatmul.mubr.msk.f32.vlgmr.msra.gmra.mrb[24].mxu1 %vm782_vm4, %v2705_v13 }
0x1349   :  { %3965 = vmatpush3.bf16.msra.mxu1 %v3964_v10  ;;  %3801 = vmatprep.mubr.msk.f32.mxu1 %vm4200_vm3, %v4198_v6 }
0x134a   :  { %3966 = vmatprep.subr.bf16.mxu1 %v4199_v30 }
0x134d   :  { %3968 = vmatpush3.bf16.msra.mxu1 %v3967_v39 }
0x134e   :  { %3975 = vmatprep.subr.bf16.mxu1 %v4199_v30 }
0x1350   :  { %3802 = vmatmul.mubr.msk.f32.vlgmr.msra.gmra.mrb[26].mxu1 %vm782_vm4, %v2705_v13 }
0x1351   :  { %3823 = vmatprep.mubr.msk.f32.mxu1 %vm4200_vm3, %v4198_v6 }
0x13b1   :  { %v2566_v14 = vpop.f32.mrb[22].mxu1 }
0x13b2   :  { %v3759_v25 = vpop.f32.mrb[23].mxu1 }
0x141b   :  { %v4908_v15 = vpop.f32.mrb[24].mxu1 }
0x141c   :  { %v3781_v45 = vpop.f32.mrb[25].mxu1 }
0x1423   :  { %v2960_v17 = vpop.f32.mrb[26].mxu1 }
0x1424   :  { %v2961_v19 = vadd.f32 %v3422_v16, %v2960_v17  ;;  %v3803_v20 = vpop.f32.mrb[27].mxu1 }
0x1425   :  { %v3428_v20 = vld [vmem:[%s5062_s5 + $0x130] sm:$0xff] }
0x1426   :  { %2972 = vrot.lane.b32.xlu1 %v2961_v19, %s4201_s19  ;;  %v2964_v24 = vadd.f32 %v2961_v19, %v756_v23  ;;  %v3427_v19 = vld [vmem:[%s5062_s5 + $0x128] sm:$0xff] }
0x1427   :  { %v3973_v9 = vpack.c.bf16 %v3428_v20, %v3427_v19 }
0x1428   :  { %v3424_v46 = vmul.f32 -1.442695, %v2964_v24 }
0x142a   :  { %4131 = vpow2.f32 %v3424_v46 }
0x1434   :  { %v4132_v26 = vpop.eup %4131 }
0x1435   :  { %v2968_v27 = vadd.f32 1.0, %v4132_v26  ;;  %v4084_v26 = vpack.i.bf16 %v3428_v20, %v3427_v19 }
0x1437   :  { %4133 = vrcp.f32 %v2968_v27 }
0x1441   :  { %v4929_v28 = vpop.eup %4133 }
0x1442   :  { %v2982_v13 = vsub.f32 1.0, %v4929_v28 }
0x1498   :  { %v2973_v32 = vpop.permute.xlu1 %2972 }
0x1499   :  { %v2975_v35 = vmul.f32 %v4929_v28, %v2973_v32 }
0x149b   :  { %2977 = vrot.lane.b32.xlu0 %v2975_v35, %s4201_s19 }
0x149f   :  { %2991 = vrot.lane.b32.xlu0 %v772_v47, %s4203_s25  ;;  %s4204_s25 = smov 4  }
0x14a3   :  { %4075 = vrot.lane.b32.xlu0 %v4074_v50, %s4202_s21 }
0x14a7   :  { %4080 = vrot.lane.b32.xlu0 %v4079_v48, %s4202_s21 }
0x14ab   :  { %1286 = vrot.lane.b32.xlu0 %v4574_v33, %s4202_s21 }
0x14af   :  { %1890 = vrot.lane.b32.xlu0 %v4716_v38, %s4202_s21 }
0x14b3   :  { %2494 = vrot.lane.b32.xlu0 %v4858_v53, %s4202_s21 }
0x14b7   :  { %3098 = vrot.lane.b32.xlu0 %v4950_v36, %s4202_s21 }
0x150d   :  { %v2978_v29 = vpop.permute.xlu0 %2977 }
0x150e   :  { %v2980_v42 = vadd.f32 %v2978_v29, %v756_v23 }
0x1510   :  { %4135 = vtanh.f32 %v2980_v42 }
0x1511   :  { %v2992_v43 = vpop.permute.xlu0 %2991 }
0x1515   :  { %v4076_v51 = vpop.permute.xlu0 %4075 }
0x1516   :  { %v4078_v16 = vunpack.i.h.bf16 %v4076_v51  ;;  %v4077_v21 = vunpack.i.l.bf16 %v4076_v51 }
0x1518   :  { %v3961_v27 = vpack.c.bf16 %v4078_v16, %v4077_v21  ;;  %v3434_v16 = vld [vmem:[%s5063_s6 + $0x20] ss:$0 sm:$0xff] }
0x1519   :  { %v4081_v33 = vpop.permute.xlu0 %4080 }
0x151a   :  { %v4136_v49 = vpop.eup %4135  ;;  %v4083_v52 = vunpack.i.h.bf16 %v4081_v33  ;;  %v4082_v38 = vunpack.i.l.bf16 %v4081_v33 }
0x151b   :  { %2984 = vrot.lane.b32.xlu1 %v4136_v49, %s4202_s21 }
0x151c   :  { %v3976_v56 = vpack.c.bf16 %v4083_v52, %v4082_v38 }
0x151d   :  { %v1287_v53 = vpop.permute.xlu0 %1286 }
0x151e   :  { %v1359_v54 = vadd.f32 %v4621_v59, %v1287_v53  ;;  %3977 = vmatpush3.bf16.msra.mxu1 %v3976_v56 }
0x151f   :  { %4070 = vrot.lane.b32.xlu1 %v4069_v37, %s4202_s21  ;;  %3978 = vmatprep.subr.bf16.mxu1 %v4199_v30 }
0x1520   :  { %v3331_v58 = vmul.f32 -1.442695, %v1359_v54 }
0x1521   :  { %v1891_v34 = vpop.permute.xlu0 %1890 }
0x1522   :  { %4137 = vpow2.f32 %v3331_v58  ;;  %v1963_v63 = vadd.f32 %v4763_v2, %v1891_v34 }
0x1524   :  { %v3365_v0 = vmul.f32 -1.442695, %v1963_v63 }
0x1525   :  { %v2495_v1 = vpop.permute.xlu0 %2494 }
0x1526   :  { %4139 = vpow2.f32 %v3365_v0  ;;  %v2567_v3 = vadd.f32 %v2566_v14, %v2495_v1  ;;  %v2988_v14 = vmul.f32 %v4929_v28, %v4853_v55  ;;  %v3413_v55 = vld [vmem:[%s5062_s5 + $0x110] ss:$0 sm:$0xff] }
0x1527   :  { %v2775_v28 = vadd.f32 %v3413_v55, %v4908_v15  ;;  %v3186_v15 = vld [vmem:[%s5063_s6] sm:$0xff] }
0x1528   :  { %v3399_v4 = vmul.f32 -1.442695, %v2567_v3 }
0x1529   :  { %v2778_v32 = vmax.f32 %v2775_v28, 0.0  ;;  %v3099_v1 = vpop.permute.xlu0 %3098 }
0x152a   :  { %4141 = vpow2.f32 %v3399_v4 }
0x152c   :  { %v4138_v60 = vpop.eup %4137 }
0x152d   :  { %v1365_v61 = vadd.f32 1.0, %v4138_v60 }
0x152f   :  { %4143 = vrcp.f32 %v1365_v61 }
0x1530   :  { %v4140_v59 = vpop.eup %4139 }
0x1531   :  { %v1969_v5 = vadd.f32 1.0, %v4140_v59 }
0x1533   :  { %4145 = vrcp.f32 %v1969_v5 }
0x1534   :  { %v4142_v7 = vpop.eup %4141 }
0x1535   :  { %v2573_v10 = vadd.f32 1.0, %v4142_v7 }
0x1537   :  { %4147 = vrcp.f32 %v2573_v10 }
0x1539   :  { %v4144_v11 = vpop.eup %4143 }
0x153a   :  { %1369 = vrot.lane.b32.xlu0 %v4144_v11, %s4204_s25 }
0x153d   :  { %v4146_v12 = vpop.eup %4145 }
0x153e   :  { %1973 = vrot.lane.b32.xlu0 %v4146_v12, %s4205_s29 }
0x1541   :  { %v4148_v2 = vpop.eup %4147 }
0x1542   :  { %2577 = vrot.lane.b32.xlu0 %v4148_v2, %s4206_s30 }
0x158d   :  { %v2985_v39 = vpop.permute.xlu1 %2984 }
0x158e   :  { %v2987_v25 = vmul.f32 %v2985_v39, %v2982_v13 }
0x1590   :  { %v2989_v45 = vadd.f32 %v2988_v14, %v2987_v25 }
0x1591   :  { %v4071_v17 = vpop.permute.xlu1 %4070 }
0x1592   :  { %v4073_v22 = vunpack.i.h.bf16 %v4071_v17  ;;  %v4072_v23 = vunpack.i.l.bf16 %v4071_v17  ;;  %v2994_v24 = vadd.f32 %v2992_v43, %v2989_v45 }
0x1594   :  { %v3958_v46 = vpack.c.bf16 %v4073_v22, %v4072_v23  ;;  %3006 = vrot.lane.b32.xlu1 %v2994_v24, %s4202_s21 }
0x1596   :  { %3959 = vmatpush3.bf16.msra.mxu0 %v3958_v46 }
0x1597   :  { %3960 = vmatprep.subr.bf16.mxu0 %v4199_v30 }
0x1598   :  { %4085 = vrot.lane.b32.xlu1 %v4084_v26, %s4202_s21 }
0x159a   :  { %3962 = vmatpush3.bf16.msra.mxu0 %v3961_v27 }
0x159b   :  { %3969 = vmatprep.subr.bf16.mxu0 %v4199_v30 }
0x159c   :  { %1588 = vrot.lane.b32.xlu1 %v4645_v31, %s4202_s21  ;;  %v4173_v31 = vld [vmem:[%s5062_s5 + $0x20] ss:$0 sm:$0xff]  ;;  %s4207_s5 = smov 8  }
0x159d   :  { %3791 = vmatmul.mubr.msk.f32.vlgmr.msra.gmra.mrb[24].mxu0 %vm782_vm4, %v2778_v32 }
0x159e   :  { %3971 = vmatpush3.bf16.msra.mxu0 %v3970_v41  ;;  %3812 = vmatprep.mubr.msk.f32.mxu0 %vm4200_vm3, %v4198_v6  ;;  %v3189_v41 = vld [vmem:[%s5063_s6 + $0x18] sm:$0xff]  ;;  %s4210_s6 = smov [#allocation2]  }
0x159f   :  { %3972 = vmatprep.subr.bf16.mxu0 %v4199_v30  ;;  %v3985_v47 = vpack.c.bf16 %v3189_v41, %v3188_v18  ;;  %s3279_s14 = sshll.u32 %s4210_s6, 4  ;;  %s3280_s14 = int_to_ptr.vmem [resolvable:$true] %s3279_s14 }
0x15a0   :  { %2192 = vrot.lane.b32.xlu1 %v4787_v44, %s4202_s21  ;;  %v3982_v44 = vpack.c.bf16 %v3187_v40, %v3186_v15  ;;  %s4174_s15 = scalar_lea.vmem %s3280_s14, 128  ;;  %p4179_p1 = scmp.lt.s32.totalorder %s3280_s14, %s3280_s14 }
0x15a1   :  { %p4175_p0 = scmp.ne.s32.totalorder %s3280_s14, %s4174_s15  ;;  %p4180_p2 = scmp.lt.s32.totalorder %s4174_s15, %s4174_s15 }
0x15a2   :  { %3974 = vmatpush3.bf16.msra.mxu0 %v3973_v9 }
0x15a3   :  { %3981 = vmatprep.subr.bf16.mxu0 %v4199_v30  ;;  %p4181_p3 = por %p4180_p2, %p4179_p1 }
0x15a4   :  { %2796 = vrot.lane.b32.xlu1 %v3413_v55, %s4202_s21 }
0x15a5   :  { %p4182_p4 = pnand %p4181_p3, %p4175_p0 }
0x15a8   :  { %989 = vrot.lane.b32.xlu1 %v4173_v31, %s4202_s21  ;;  %s4208_s21 = smov 16  }
0x15ac   :  { %v1370_v3 = vpop.permute.xlu0 %1369 }
0x15b0   :  { %v1974_v11 = vpop.permute.xlu0 %1973 }
0x15b4   :  { %v2578_v13 = vpop.permute.xlu0 %2577 }
0x1606   :  { %v3007_v35 = vpop.permute.xlu1 %3006 }
0x1607   :  { %3813 = vmatmul.mubr.msk.f32.vlgmr.msra.gmra.mrb[26].mxu0 %vm782_vm4, %v3007_v35 }
0x1608   :  { %3983 = vmatpush3.bf16.msra.mxu0 %v3982_v44  ;;  %3834 = vmatprep.mubr.msk.f32.mxu0 %vm4200_vm3, %v4198_v6 }
0x1609   :  { %3984 = vmatprep.subr.bf16.mxu0 %v4199_v30 }
0x160a   :  { %v4086_v50 = vpop.permute.xlu1 %4085 }
0x160b   :  { %v4088_v48 = vunpack.i.h.bf16 %v4086_v50  ;;  %v4087_v29 = vunpack.i.l.bf16 %v4086_v50 }
0x160c   :  { %3986 = vmatpush3.bf16.msra.mxu0 %v3985_v47 }
0x160d   :  { %v3979_v42 = vpack.c.bf16 %v4088_v48, %v4087_v29 }
0x160e   :  { %v1589_v43 = vpop.permute.xlu1 %1588 }
0x160f   :  { %v1661_v51 = vadd.f32 %v4692_v62, %v1589_v43  ;;  %3835 = vmatmul.mubr.msk.f32.vlgmr.msra.gmra.mrb[28].mxu0 %vm782_vm4, %v3007_v35  ;;  %3980 = vmatpush3.bf16.msra.mxu1 %v3979_v42 }
0x1611   :  { %v3348_v33 = vmul.f32 -1.442695, %v1661_v51 }
0x1612   :  { %v2193_v49 = vpop.permute.xlu1 %2192 }
0x1613   :  { %4149 = vpow2.f32 %v3348_v33  ;;  %v2265_v52 = vadd.f32 %v4834_v8, %v2193_v49 }
0x1615   :  { %v3382_v38 = vmul.f32 -1.442695, %v2265_v52 }
0x1616   :  { %v2797_v6 = vpop.permute.xlu1 %2796 }
0x1617   :  { %4151 = vpow2.f32 %v3382_v38 }
0x161a   :  { %v990_v30 = vpop.permute.xlu1 %989 }
0x161b   :  { %v1062_v37 = vadd.f32 %v4550_v57, %v990_v30 }
0x161d   :  { %v4150_v56 = vpop.eup %4149  ;;  %v3314_v53 = vmul.f32 -1.442695, %v1062_v37 }
0x161e   :  { %v1667_v54 = vadd.f32 1.0, %v4150_v56 }
0x161f   :  { %4153 = vpow2.f32 %v3314_v53 }
0x1620   :  { %4155 = vrcp.f32 %v1667_v54 }
0x1621   :  { %v4152_v62 = vpop.eup %4151 }
0x1622   :  { %v2271_v58 = vadd.f32 1.0, %v4152_v62 }
0x1624   :  { %4157 = vrcp.f32 %v2271_v58 }
0x1629   :  { %v4154_v34 = vpop.eup %4153 }
0x162a   :  { %v4156_v63 = vpop.eup %4155  ;;  %v1068_v0 = vadd.f32 1.0, %v4154_v34 }
0x162b   :  { %1671 = vrot.lane.b32.xlu1 %v4156_v63, %s4207_s5 }
0x162c   :  { %4159 = vrcp.f32 %v1068_v0 }
0x162e   :  { %v4158_v8 = vpop.eup %4157 }
0x162f   :  { %2275 = vrot.lane.b32.xlu1 %v4158_v8, %s4208_s21 }
0x1636   :  { %v4160_v57 = vpop.eup %4159 }
0x1637   :  { %1071 = vst.msk [vmem:[%s5065_s8] sm:$0xff] %vm392_vm2, %v4160_v57 }
0x1638   :  { %1373 = vst.msk [vmem:[%s5065_s8] sm:$0xff] %vm1372_vm5, %v1370_v3 }
0x1670   :  { %v2868_v4 = vpop.f32.mrb[24].mxu0 }
0x1671   :  { %v2869_v60 = vadd.f32 %v2868_v4, %v2797_v6  ;;  %v3792_v61 = vpop.f32.mrb[25].mxu0 }
0x1673   :  { %v3416_v59 = vmul.f32 -1.442695, %v2869_v60 }
0x1675   :  { %4161 = vpow2.f32 %v3416_v59 }
0x167f   :  { %v4162_v5 = vpop.eup %4161 }
0x1680   :  { %v2875_v7 = vadd.f32 1.0, %v4162_v5 }
0x1682   :  { %4163 = vrcp.f32 %v2875_v7 }
0x168c   :  { %v4164_v10 = vpop.eup %4163 }
0x168d   :  { %2879 = vrot.lane.b32.xlu1 %v4164_v10, %s4209_s28 }
0x169d   :  { %v1672_v12 = vpop.permute.xlu1 %1671 }
0x169e   :  { %1675 = vst.msk [vmem:[%s5065_s8] sm:$0xff] %vm1674_vm6, %v1672_v12 }
0x169f   :  { %1977 = vst.msk [vmem:[%s5065_s8] sm:$0xff] %vm1976_vm7, %v1974_v11 }
0x16a1   :  { %v2276_v2 = vpop.permute.xlu1 %2275 }
0x16a2   :  { %2279 = vst.msk [vmem:[%s5065_s8] sm:$0xff] %vm2278_vm8, %v2276_v2 }
0x16a3   :  { %2581 = vst.msk [vmem:[%s5065_s8] sm:$0xff] %vm2580_vm9, %v2578_v13 }
0x16da   :  { %v3076_v39 = vpop.f32.mrb[26].mxu0 }
0x16db   :  { %v3077_v14 = vadd.f32 %v4950_v36, %v3076_v39  ;;  %v3814_v25 = vpop.f32.mrb[27].mxu0 }
0x16dd   :  { %v3080_v45 = vmax.f32 %v3077_v14, 0.0 }
0x16df   :  { %3824 = vmatmul.mubr.msk.f32.vlgmr.msra.gmra.mrb[28].mxu1 %vm782_vm4, %v3080_v45 }
0x16e2   :  { %v3261_v17 = vpop.f32.mrb[28].mxu0 }
0x16e3   :  { %v3262_v19 = vadd.f32 %v3434_v16, %v3261_v17  ;;  %v3836_v20 = vpop.f32.mrb[29].mxu0 }
0x16e5   :  { %v3436_v21 = vmul.f32 -1.442695, %v3262_v19 }
0x16e7   :  { %4165 = vpow2.f32 %v3436_v21 }
0x16f1   :  { %v4166_v22 = vpop.eup %4165 }
0x16f2   :  { %v3268_v23 = vadd.f32 1.0, %v4166_v22 }
0x16f4   :  { %4167 = vrcp.f32 %v3268_v23 }
0x16fe   :  { %v4168_v24 = vpop.eup %4167 }
0x16ff   :  { %v2880_v36 = vpop.permute.xlu1 %2879  ;;  %3272 = vst.msk [vmem:[#allocation2] sm:$0xff] %vm3271_vm10, %v4168_v24 }
0x1700   :  { %2883 = vst.msk [vmem:[%s5065_s8] sm:$0xff] %vm2882_vm11, %v2880_v36 }
0x17b2   :  { %v3170_v55 = vpop.f32.mrb[28].mxu1 }
0x17b3   :  { %v3171_v46 = vadd.f32 %v3170_v55, %v3099_v1  ;;  %v3825_v26 = vpop.f32.mrb[29].mxu1 }
0x17b5   :  { %v3433_v27 = vmul.f32 -1.442695, %v3171_v46 }
0x17b7   :  { %4169 = vpow2.f32 %v3433_v27 }
0x17c1   :  { %v4170_v28 = vpop.eup %4169 }
0x17c2   :  { %v3177_v32 = vadd.f32 1.0, %v4170_v28 }
0x17c3   :  { %4185 = shalt.err (!%p4182_p4)
}
0x17c4   :  { %s4186_s18 = scalar_lea.hbm %s5064_s7, 128 }
0x17c5   :  { %p4187_p5 = scmp.ne.s32.totalorder %s5064_s7, %s4186_s18  ;;  %p4190_p6 = scmp.lt.u32.totalorder %s4186_s18, %s5064_s7 }
0x17c7   :  { %p4192_p7 = pnand %p4190_p6, %p4187_p5 }
0x17c9   :  { %4195 = shalt.err (!%p4192_p7)
}
0x17ca   :  { %3282 = dma.vmem_to_hbm [thread:$0]  %s3280_s14, 128, %s5064_s7, [#allocation3]   ;;  %4171 = vrcp.f32 %v3177_v32  ;;  %vm3184_vm12 = vcmask 261344  }
0x17cb   :  { %s4211_s24 = smov 28  }
0x17d4   :  { %v4172_v9 = vpop.eup %4171 }
0x17d5   :  { %3181 = vrot.lane.b32.xlu0 %v4172_v9, %s4211_s24 }
0x1847   :  { %v3182_v31 = vpop.permute.xlu0 %3181 }
0x1848   :  { %3185 = vst.msk [vmem:[%s5065_s8] sm:$0xff] %vm3184_vm12, %v3182_v31 }
0x1849   :  { %4196 = dma.done.wait [#allocation3], 128  }
0x184a   :  { %4197 = vsyncadd [#allocation3], 4294967168 }
0x184b   :  { %3290 = vsyncpa [#allocation3], 1 }

</bundles_post_ra>
